<compile_context>
chip_gen: v6e
topology: v6e:2x2x1
jax: 0.10.0
libtpu: 0.0.40
codegen_flags: <defaults>
</compile_context>

<pallas_src>
import math

import jax
import jax.numpy as jnp
from jax import lax
from jax.experimental import pallas as pl
from jax.experimental.pallas import tpu as pltpu

# ----- config (SpectrogramFeatures defaults, feat_type='logspect') -----
SAMPLE_RATE = 8000
WINDOW_SIZE = 0.02
WINDOW_STRIDE = 0.01
WIN_LENGTH = int(SAMPLE_RATE * WINDOW_SIZE)      # 160
HOP_LENGTH = int(SAMPLE_RATE * WINDOW_STRIDE)    # 80
N_FFT = 2 ** math.ceil(math.log2(WIN_LENGTH))    # 256
N_FREQ = N_FFT // 2 + 1                          # 129 (onesided)
N_FREQ_PAD = 256                                 # lane-dense frequency axis
N_CHUNKS = -(-N_FFT // HOP_LENGTH)               # 4 shifted-view matmuls (K padded to 320)
DITHER = 1e-5
PAD_TO = 8
FRAME_SPLICING = 1                               # default -> splice_frames is a no-op
MAX_T_BLOCK = 256                                # frames per grid step (multiple of 8)
# TODO(synk): FilterbankFeatures (librosa mel filterbank) path not implemented;
# default feat_type 'logspect' (SpectrogramFeatures) is what this reproduces.


def _round_up(x, m):
    return (x + m - 1) // m * m


def _windowed_dft():
    """(N_CHUNKS, HOP, 2*N_FREQ_PAD) f32 constant: hamming window folded into [cos | -sin]."""
    # torch.hamming_window(WIN_LENGTH, periodic=False), zero-padded/centered to n_fft
    m = jnp.arange(WIN_LENGTH, dtype=jnp.float32)
    ham = 0.54 - 0.46 * jnp.cos(2.0 * jnp.pi * m / (WIN_LENGTH - 1))
    lpad = (N_FFT - WIN_LENGTH) // 2
    win = jnp.zeros((N_FFT,), jnp.float32).at[lpad:lpad + WIN_LENGTH].set(ham)

    n = jnp.arange(N_FFT, dtype=jnp.float32)[:, None]
    f = jnp.arange(N_FREQ, dtype=jnp.float32)[None, :]
    ang = 2.0 * jnp.pi * n * f / float(N_FFT)
    cos_w = win[:, None] * jnp.cos(ang)              # (N_FFT, N_FREQ)
    sin_w = win[:, None] * (-jnp.sin(ang))

    pad_f = N_FREQ_PAD - N_FREQ
    w = jnp.concatenate([jnp.pad(cos_w, ((0, 0), (0, pad_f))),
                         jnp.pad(sin_w, ((0, 0), (0, pad_f)))], axis=1)   # (256, 512)
    w = jnp.pad(w, ((0, N_CHUNKS * HOP_LENGTH - N_FFT), (0, 0)))          # (320, 512)
    return w.reshape(N_CHUNKS, HOP_LENGTH, 2 * N_FREQ_PAD)


def _make_kernels(t_blk):
    """Build the two kernels for a given time-block size (multiple of 8)."""

    def logspec_tile(rows_ref, w_ref, t0):
        # rows_ref: (R, HOP) hop-sized waveform rows resident in VMEM.
        # frame t covers rows[t : t+4], so the STFT of a block of t_blk frames is
        # sum_c rows[t0+c : t0+c+t_blk] @ W_c  (window already folded into W).
        chunk = rows_ref[pl.ds(t0, t_blk + 8), :]                  # (t_blk+8, HOP)
        acc = jnp.zeros((t_blk, 2 * N_FREQ_PAD), jnp.float32)
        for c in range(N_CHUNKS):                                  # 4 MXU matmuls
            acc = acc + jnp.dot(chunk[c:c + t_blk, :], w_ref[c],
                                preferred_element_type=jnp.float32)
        re = acc[:, :N_FREQ_PAD]
        im = acc[:, N_FREQ_PAD:]
        mag = jnp.sqrt(re * re + im * im)                          # sqrt(pow(2).sum(-1))
        return jnp.log(mag + 1e-20)                                # (t_blk, 256)

    def stats_kernel(seq_ref, rows_ref, w_ref, sum_ref, sq_ref):
        i = pl.program_id(0)
        t0 = pl.multiple_of(i * t_blk, 8)
        x = logspec_tile(rows_ref, w_ref, t0)
        valid = (t0 + lax.broadcasted_iota(jnp.int32, x.shape, 0)) < seq_ref[0]
        xm = jnp.where(valid, x, 0.0)

        @pl.when(i == 0)
        def _():
            sum_ref[...] = jnp.zeros_like(sum_ref)
            sq_ref[...] = jnp.zeros_like(sq_ref)

        sum_ref[...] += jnp.sum(xm, axis=0, keepdims=True)
        sq_ref[...] += jnp.sum(xm * xm, axis=0, keepdims=True)

    def norm_kernel(seq_ref, rows_ref, w_ref, sum_ref, sq_ref, out_ref):
        i = pl.program_id(0)
        t0 = pl.multiple_of(i * t_blk, 8)
        x = logspec_tile(rows_ref, w_ref, t0)                      # recompute (cheaper than HBM round trip)
        n = seq_ref[0]
        nf = n.astype(jnp.float32)
        mean = sum_ref[...] / nf                                   # (1, 256)
        # torch.std is unbiased (ddof=1); clamp tiny negative var from cancellation,
        # guard the seq_len==1 corner case.
        var = (sq_ref[...] - nf * mean * mean) / jnp.maximum(nf - 1.0, 1.0)
        inv_std = 1.0 / (jnp.sqrt(jnp.maximum(var, 0.0)) + 1e-5)
        valid = (t0 + lax.broadcasted_iota(jnp.int32, x.shape, 0)) < n
        # masked_fill(time >= seq_len, 0); also zeros the pad_to padding region
        out_ref[...] = jnp.where(valid, (x - mean) * inv_std, 0.0)

    return stats_kernel, norm_kernel


@jax.jit
def audio_preprocessing(input_signal, key):
    """input_signal: (L,) float waveform. Returns (n_freq, T_out) float32."""
    L = int(input_signal.shape[0])
    seq_len = int(math.ceil(L / HOP_LENGTH))             # get_seq_len
    num_frames = 1 + L // HOP_LENGTH                     # torch.stft, center=True

    # pad_to handling (SpectrogramFeatures only pads when remainder != 0)
    t_out = num_frames
    if PAD_TO > 0 and (num_frames % PAD_TO) != 0:
        t_out = num_frames + (PAD_TO - num_frames % PAD_TO)

    t_blk = min(MAX_T_BLOCK, _round_up(t_out, 8))
    n_tiles = -(-t_out // t_blk)
    t_grid = n_tiles * t_blk

    x = input_signal.astype(jnp.float32)
    if DITHER > 0:
        # TODO(synk): dither could move in-kernel via pltpu.prng_*, but it must be
        # applied once to the waveform (shared by both passes), so it stays here
        # (fused under jit with pad/reshape). RNG not bit-exact with torch.randn.
        x = x + DITHER * jax.random.normal(key, x.shape, dtype=jnp.float32)

    # torch.stft defaults: center=True, pad_mode='reflect' (requires L > n_fft//2)
    pad = N_FFT // 2
    xp = jnp.pad(x, (pad, pad), mode="reflect")

    # reshape into hop-sized rows (no strided gather, ~3.2x less HBM than frames)
    n_rows = t_grid + 8
    xp = jnp.pad(xp, (0, n_rows * HOP_LENGTH - xp.shape[0]))
    rows = xp.reshape(n_rows, HOP_LENGTH)

    w = _windowed_dft()                                  # constant-folded under jit
    seq_arr = jnp.array([seq_len], jnp.int32)

    stats_kernel, norm_kernel = _make_kernels(t_blk)
    smem = pl.BlockSpec(memory_space=pltpu.MemorySpace.SMEM)
    vmem = pl.BlockSpec(memory_space=pltpu.MemorySpace.VMEM)

    stat_shape = jax.ShapeDtypeStruct((1, N_FREQ_PAD), jnp.float32)
    stat_spec = pl.BlockSpec((1, N_FREQ_PAD), lambda i: (0, 0))

    # pass 1: per-feature sum / sumsq over valid frames (resident accumulator outputs)
    sum_o, sq_o = pl.pallas_call(
        stats_kernel,
        grid=(n_tiles,),
        out_shape=(stat_shape, stat_shape),
        in_specs=[smem, vmem, vmem],
        out_specs=(stat_spec, stat_spec),
        compiler_params=pltpu.CompilerParams(dimension_semantics=("arbitrary",)),
    )(seq_arr, rows, w)

    # pass 2: recompute log-spec tile, normalize, mask, lane-dense tiled stores
    spec_tf = pl.pallas_call(
        norm_kernel,
        grid=(n_tiles,),
        out_shape=jax.ShapeDtypeStruct((t_grid, N_FREQ_PAD), jnp.float32),
        in_specs=[smem, vmem, vmem, vmem, vmem],
        out_specs=pl.BlockSpec((t_blk, N_FREQ_PAD), lambda i: (i, 0)),
        compiler_params=pltpu.CompilerParams(dimension_semantics=("parallel",)),
    )(seq_arr, rows, w, sum_o, sq_o)

    # module output (transpose_out=False): (n_freq, T_out)
    return spec_tf[:t_out, :N_FREQ].T


if __name__ == "__main__":
    key = jax.random.PRNGKey(0)
    sig_key, dith_key = jax.random.split(key)
    L = 800                                    # -> seq_len=10, num_frames=11, T_out=16
    input_signal = jax.random.normal(sig_key, (L,), dtype=jnp.float32)

    out = audio_preprocessing(input_signal, dith_key)
    out = jax.block_until_ready(out)

    assert out.shape == (N_FREQ, 16), out.shape
    assert bool(jnp.all(jnp.isfinite(out)))
    # frames at/after seq_len (=10) must be masked to zero
    assert float(jnp.max(jnp.abs(out[:, 10:]))) == 0.0
    print("KERNEL_OK")
</pallas_src>

<mosaic_0001>
module attributes {stable_mosaic.version = 11 : i64} {
  func.func @stats_kernel(%arg0: i32, %arg1: memref<1xi32, #tpu.memory_space<smem>>, %arg2: memref<24x80xf32, #tpu.memory_space<vmem>>, %arg3: memref<4x80x512xf32, #tpu.memory_space<vmem>>, %arg4: memref<1x256xf32, #tpu.memory_space<vmem>>, %arg5: memref<1x256xf32, #tpu.memory_space<vmem>>) attributes {dimension_semantics = [#tpu.dimension_semantics<arbitrary>], iteration_bounds = array<i64: 1>, scalar_prefetch = 0 : i64, scratch_operands = 0 : i64, tpu.core_type = #tpu.core_type<tc>, window_params = [{transform_indices = @transform_0, window_bounds = array<i64: 1>}, {pipeline_mode = #tpu.pipeline_mode<synchronous>, transform_indices = @transform_1, window_bounds = array<i64: 24, 80>}, {pipeline_mode = #tpu.pipeline_mode<synchronous>, transform_indices = @transform_2, window_bounds = array<i64: 4, 80, 512>}, {pipeline_mode = #tpu.pipeline_mode<synchronous>, transform_indices = @transform_3, window_bounds = array<i64: 1, 256>}, {pipeline_mode = #tpu.pipeline_mode<synchronous>, transform_indices = @transform_4, window_bounds = array<i64: 1, 256>}]} {
    %c16_i32 = arith.constant 16 : i32
    %0 = arith.muli %arg0, %c16_i32 : i32
    %1 = tpu.assume_multiple %0, 8 : i32
    %2 = arith.index_cast %1 : i32 to index
    %c0 = arith.constant 0 : index
    %3 = vector.load %arg2[%2, %c0] : memref<24x80xf32, #tpu.memory_space<vmem>>, vector<24x80xf32>
    %cst = arith.constant 0.000000e+00 : f32
    %4 = vector.broadcast %cst : f32 to vector<16x512xf32>
    %5 = vector.extract_strided_slice %3 {offsets = [0, 0], sizes = [16, 80], strides = [1, 1]} : vector<24x80xf32> to vector<16x80xf32>
    %c0_0 = arith.constant 0 : index
    %c0_1 = arith.constant 0 : index
    %c0_2 = arith.constant 0 : index
    %6 = vector.load %arg3[%c0_0, %c0_1, %c0_2] : memref<4x80x512xf32, #tpu.memory_space<vmem>>, vector<1x80x512xf32>
    %7 = vector.shape_cast %6 : vector<1x80x512xf32> to vector<80x512xf32>
    %cst_3 = arith.constant dense<0.000000e+00> : vector<16x512xf32>
    %8 = tpu.matmul %5, %7, %cst_3 {dimension_numbers = #tpu.dot_dimension_numbers<[1], [0], [0], [1], [0, 0, 1, 1], [], []>} : vector<16x80xf32>, vector<80x512xf32>, vector<16x512xf32> -> vector<16x512xf32>
    %9 = arith.addf %4, %8 : vector<16x512xf32>
    %10 = vector.extract_strided_slice %3 {offsets = [1, 0], sizes = [16, 80], strides = [1, 1]} : vector<24x80xf32> to vector<16x80xf32>
    %c1 = arith.constant 1 : index
    %c0_4 = arith.constant 0 : index
    %c0_5 = arith.constant 0 : index
    %11 = vector.load %arg3[%c1, %c0_4, %c0_5] : memref<4x80x512xf32, #tpu.memory_space<vmem>>, vector<1x80x512xf32>
    %12 = vector.shape_cast %11 : vector<1x80x512xf32> to vector<80x512xf32>
    %cst_6 = arith.constant dense<0.000000e+00> : vector<16x512xf32>
    %13 = tpu.matmul %10, %12, %cst_6 {dimension_numbers = #tpu.dot_dimension_numbers<[1], [0], [0], [1], [0, 0, 1, 1], [], []>} : vector<16x80xf32>, vector<80x512xf32>, vector<16x512xf32> -> vector<16x512xf32>
    %14 = arith.addf %9, %13 : vector<16x512xf32>
    %15 = vector.extract_strided_slice %3 {offsets = [2, 0], sizes = [16, 80], strides = [1, 1]} : vector<24x80xf32> to vector<16x80xf32>
    %c2 = arith.constant 2 : index
    %c0_7 = arith.constant 0 : index
    %c0_8 = arith.constant 0 : index
    %16 = vector.load %arg3[%c2, %c0_7, %c0_8] : memref<4x80x512xf32, #tpu.memory_space<vmem>>, vector<1x80x512xf32>
    %17 = vector.shape_cast %16 : vector<1x80x512xf32> to vector<80x512xf32>
    %cst_9 = arith.constant dense<0.000000e+00> : vector<16x512xf32>
    %18 = tpu.matmul %15, %17, %cst_9 {dimension_numbers = #tpu.dot_dimension_numbers<[1], [0], [0], [1], [0, 0, 1, 1], [], []>} : vector<16x80xf32>, vector<80x512xf32>, vector<16x512xf32> -> vector<16x512xf32>
    %19 = arith.addf %14, %18 : vector<16x512xf32>
    %20 = vector.extract_strided_slice %3 {offsets = [3, 0], sizes = [16, 80], strides = [1, 1]} : vector<24x80xf32> to vector<16x80xf32>
    %c3 = arith.constant 3 : index
    %c0_10 = arith.constant 0 : index
    %c0_11 = arith.constant 0 : index
    %21 = vector.load %arg3[%c3, %c0_10, %c0_11] : memref<4x80x512xf32, #tpu.memory_space<vmem>>, vector<1x80x512xf32>
    %22 = vector.shape_cast %21 : vector<1x80x512xf32> to vector<80x512xf32>
    %cst_12 = arith.constant dense<0.000000e+00> : vector<16x512xf32>
    %23 = tpu.matmul %20, %22, %cst_12 {dimension_numbers = #tpu.dot_dimension_numbers<[1], [0], [0], [1], [0, 0, 1, 1], [], []>} : vector<16x80xf32>, vector<80x512xf32>, vector<16x512xf32> -> vector<16x512xf32>
    %24 = arith.addf %19, %23 : vector<16x512xf32>
    %25 = vector.extract_strided_slice %24 {offsets = [0, 0], sizes = [16, 256], strides = [1, 1]} : vector<16x512xf32> to vector<16x256xf32>
    %26 = vector.extract_strided_slice %24 {offsets = [0, 256], sizes = [16, 256], strides = [1, 1]} : vector<16x512xf32> to vector<16x256xf32>
    %27 = arith.mulf %25, %25 : vector<16x256xf32>
    %28 = arith.mulf %26, %26 : vector<16x256xf32>
    %29 = arith.addf %27, %28 : vector<16x256xf32>
    %30 = math.sqrt %29 : vector<16x256xf32>
    %cst_13 = arith.constant 9.99999968E-21 : f32
    %31 = vector.broadcast %cst_13 : f32 to vector<16x256xf32>
    %32 = arith.addf %30, %31 : vector<16x256xf32>
    %33 = math.log %32 : vector<16x256xf32>
    %34 = tpu.iota {dimensions = array<i32: 0>} : vector<16x256xi32>
    %35 = vector.broadcast %1 : i32 to vector<16x256xi32>
    %36 = arith.addi %35, %34 : vector<16x256xi32>
    %c0_14 = arith.constant 0 : index
    %37 = memref.load %arg1[%c0_14] : memref<1xi32, #tpu.memory_space<smem>>
    %38 = vector.broadcast %37 : i32 to vector<16x256xi32>
    %39 = arith.cmpi slt, %36, %38 : vector<16x256xi32>
    %cst_15 = arith.constant 0.000000e+00 : f32
    %40 = vector.broadcast %cst_15 : f32 to vector<16x256xf32>
    %41 = arith.select %39, %33, %40 : vector<16x256xi1>, vector<16x256xf32>
    %c0_i32 = arith.constant 0 : i32
    %42 = arith.cmpi eq, %arg0, %c0_i32 : i32
    %43 = arith.extui %42 : i1 to i32
    %c0_i32_16 = arith.constant 0 : i32
    %44 = arith.cmpi ne, %43, %c0_i32_16 : i32
    scf.if %44 {
      %cst_27 = arith.constant 0.000000e+00 : f32
      %56 = vector.broadcast %cst_27 : f32 to vector<1x256xf32>
      %c0_28 = arith.constant 0 : index
      %c0_29 = arith.constant 0 : index
      %57 = vector.load %arg4[%c0_28, %c0_29] : memref<1x256xf32, #tpu.memory_space<vmem>>, vector<1x256xf32>
      tpu.vector_store %arg4[%c0_28, %c0_29], %56 {strides = array<i32>} : memref<1x256xf32, #tpu.memory_space<vmem>>, vector<1x256xf32>,
      %cst_30 = arith.constant 0.000000e+00 : f32
      %58 = vector.broadcast %cst_30 : f32 to vector<1x256xf32>
      %c0_31 = arith.constant 0 : index
      %c0_32 = arith.constant 0 : index
      %59 = vector.load %arg5[%c0_31, %c0_32] : memref<1x256xf32, #tpu.memory_space<vmem>>, vector<1x256xf32>
      tpu.vector_store %arg5[%c0_31, %c0_32], %58 {strides = array<i32>} : memref<1x256xf32, #tpu.memory_space<vmem>>, vector<1x256xf32>,
    } else {
    }
    %c0_17 = arith.constant 0 : index
    %c0_18 = arith.constant 0 : index
    %45 = vector.load %arg4[%c0_17, %c0_18] : memref<1x256xf32, #tpu.memory_space<vmem>>, vector<1x256xf32>
    %cst_19 = arith.constant dense<0.000000e+00> : vector<256xf32>
    %46 = vector.multi_reduction <add>, %41, %cst_19 [0] : vector<16x256xf32> to vector<256xf32>
    %47 = vector.shape_cast %46 : vector<256xf32> to vector<1x256xf32>
    %48 = arith.addf %45, %47 : vector<1x256xf32>
    %c0_20 = arith.constant 0 : index
    %c0_21 = arith.constant 0 : index
    %49 = vector.load %arg4[%c0_20, %c0_21] : memref<1x256xf32, #tpu.memory_space<vmem>>, vector<1x256xf32>
    tpu.vector_store %arg4[%c0_20, %c0_21], %48 {strides = array<i32>} : memref<1x256xf32, #tpu.memory_space<vmem>>, vector<1x256xf32>,
    %c0_22 = arith.constant 0 : index
    %c0_23 = arith.constant 0 : index
    %50 = vector.load %arg5[%c0_22, %c0_23] : memref<1x256xf32, #tpu.memory_space<vmem>>, vector<1x256xf32>
    %51 = arith.mulf %41, %41 : vector<16x256xf32>
    %cst_24 = arith.constant dense<0.000000e+00> : vector<256xf32>
    %52 = vector.multi_reduction <add>, %51, %cst_24 [0] : vector<16x256xf32> to vector<256xf32>
    %53 = vector.shape_cast %52 : vector<256xf32> to vector<1x256xf32>
    %54 = arith.addf %50, %53 : vector<1x256xf32>
    %c0_25 = arith.constant 0 : index
    %c0_26 = arith.constant 0 : index
    %55 = vector.load %arg5[%c0_25, %c0_26] : memref<1x256xf32, #tpu.memory_space<vmem>>, vector<1x256xf32>
    tpu.vector_store %arg5[%c0_25, %c0_26], %54 {strides = array<i32>} : memref<1x256xf32, #tpu.memory_space<vmem>>, vector<1x256xf32>,
    return
  }
  func.func @transform_0(%arg0: i32) -> i32 {
    %c0_i32 = arith.constant 0 : i32
    %c0_i32_0 = arith.constant 0 : i32
    return %c0_i32 : i32
  }
  func.func @transform_1(%arg0: i32) -> (i32, i32) {
    %c0_i32 = arith.constant 0 : i32
    %c0_i32_0 = arith.constant 0 : i32
    %c0_i32_1 = arith.constant 0 : i32
    return %c0_i32, %c0_i32_0 : i32, i32
  }
  func.func @transform_2(%arg0: i32) -> (i32, i32, i32) {
    %c0_i32 = arith.constant 0 : i32
    %c0_i32_0 = arith.constant 0 : i32
    %c0_i32_1 = arith.constant 0 : i32
    %c0_i32_2 = arith.constant 0 : i32
    return %c0_i32, %c0_i32_0, %c0_i32_1 : i32, i32, i32
  }
  func.func @transform_3(%arg0: i32) -> (i32, i32) {
    %c0_i32 = arith.constant 0 : i32
    %c0_i32_0 = arith.constant 0 : i32
    %c0_i32_1 = arith.constant 0 : i32
    return %c0_i32, %c0_i32_0 : i32, i32
  }
  func.func @transform_4(%arg0: i32) -> (i32, i32) {
    %c0_i32 = arith.constant 0 : i32
    %c0_i32_0 = arith.constant 0 : i32
    %c0_i32_1 = arith.constant 0 : i32
    return %c0_i32, %c0_i32_0 : i32, i32
  }
}

module attributes {stable_mosaic.version = 11 : i64} {
  func.func @norm_kernel(%arg0: i32, %arg1: memref<1xi32, #tpu.memory_space<smem>>, %arg2: memref<24x80xf32, #tpu.memory_space<vmem>>, %arg3: memref<4x80x512xf32, #tpu.memory_space<vmem>>, %arg4: memref<1x256xf32, #tpu.memory_space<vmem>>, %arg5: memref<1x256xf32, #tpu.memory_space<vmem>>, %arg6: memref<16x256xf32, #tpu.memory_space<vmem>>) attributes {dimension_semantics = [#tpu.dimension_semantics<parallel>], iteration_bounds = array<i64: 1>, scalar_prefetch = 0 : i64, scratch_operands = 0 : i64, tpu.core_type = #tpu.core_type<tc>, window_params = [{transform_indices = @transform_0, window_bounds = array<i64: 1>}, {pipeline_mode = #tpu.pipeline_mode<synchronous>, transform_indices = @transform_1, window_bounds = array<i64: 24, 80>}, {pipeline_mode = #tpu.pipeline_mode<synchronous>, transform_indices = @transform_2, window_bounds = array<i64: 4, 80, 512>}, {pipeline_mode = #tpu.pipeline_mode<synchronous>, transform_indices = @transform_3, window_bounds = array<i64: 1, 256>}, {pipeline_mode = #tpu.pipeline_mode<synchronous>, transform_indices = @transform_4, window_bounds = array<i64: 1, 256>}, {transform_indices = @transform_5, window_bounds = array<i64: 16, 256>}]} {
    %c16_i32 = arith.constant 16 : i32
    %0 = arith.muli %arg0, %c16_i32 : i32
    %1 = tpu.assume_multiple %0, 8 : i32
    %2 = arith.index_cast %1 : i32 to index
    %c0 = arith.constant 0 : index
    %3 = vector.load %arg2[%2, %c0] : memref<24x80xf32, #tpu.memory_space<vmem>>, vector<24x80xf32>
    %cst = arith.constant 0.000000e+00 : f32
    %4 = vector.broadcast %cst : f32 to vector<16x512xf32>
    %5 = vector.extract_strided_slice %3 {offsets = [0, 0], sizes = [16, 80], strides = [1, 1]} : vector<24x80xf32> to vector<16x80xf32>
    %c0_0 = arith.constant 0 : index
    %c0_1 = arith.constant 0 : index
    %c0_2 = arith.constant 0 : index
    %6 = vector.load %arg3[%c0_0, %c0_1, %c0_2] : memref<4x80x512xf32, #tpu.memory_space<vmem>>, vector<1x80x512xf32>
    %7 = vector.shape_cast %6 : vector<1x80x512xf32> to vector<80x512xf32>
    %cst_3 = arith.constant dense<0.000000e+00> : vector<16x512xf32>
    %8 = tpu.matmul %5, %7, %cst_3 {dimension_numbers = #tpu.dot_dimension_numbers<[1], [0], [0], [1], [0, 0, 1, 1], [], []>} : vector<16x80xf32>, vector<80x512xf32>, vector<16x512xf32> -> vector<16x512xf32>
    %9 = arith.addf %4, %8 : vector<16x512xf32>
    %10 = vector.extract_strided_slice %3 {offsets = [1, 0], sizes = [16, 80], strides = [1, 1]} : vector<24x80xf32> to vector<16x80xf32>
    %c1 = arith.constant 1 : index
    %c0_4 = arith.constant 0 : index
    %c0_5 = arith.constant 0 : index
    %11 = vector.load %arg3[%c1, %c0_4, %c0_5] : memref<4x80x512xf32, #tpu.memory_space<vmem>>, vector<1x80x512xf32>
    %12 = vector.shape_cast %11 : vector<1x80x512xf32> to vector<80x512xf32>
    %cst_6 = arith.constant dense<0.000000e+00> : vector<16x512xf32>
    %13 = tpu.matmul %10, %12, %cst_6 {dimension_numbers = #tpu.dot_dimension_numbers<[1], [0], [0], [1], [0, 0, 1, 1], [], []>} : vector<16x80xf32>, vector<80x512xf32>, vector<16x512xf32> -> vector<16x512xf32>
    %14 = arith.addf %9, %13 : vector<16x512xf32>
    %15 = vector.extract_strided_slice %3 {offsets = [2, 0], sizes = [16, 80], strides = [1, 1]} : vector<24x80xf32> to vector<16x80xf32>
    %c2 = arith.constant 2 : index
    %c0_7 = arith.constant 0 : index
    %c0_8 = arith.constant 0 : index
    %16 = vector.load %arg3[%c2, %c0_7, %c0_8] : memref<4x80x512xf32, #tpu.memory_space<vmem>>, vector<1x80x512xf32>
    %17 = vector.shape_cast %16 : vector<1x80x512xf32> to vector<80x512xf32>
    %cst_9 = arith.constant dense<0.000000e+00> : vector<16x512xf32>
    %18 = tpu.matmul %15, %17, %cst_9 {dimension_numbers = #tpu.dot_dimension_numbers<[1], [0], [0], [1], [0, 0, 1, 1], [], []>} : vector<16x80xf32>, vector<80x512xf32>, vector<16x512xf32> -> vector<16x512xf32>
    %19 = arith.addf %14, %18 : vector<16x512xf32>
    %20 = vector.extract_strided_slice %3 {offsets = [3, 0], sizes = [16, 80], strides = [1, 1]} : vector<24x80xf32> to vector<16x80xf32>
    %c3 = arith.constant 3 : index
    %c0_10 = arith.constant 0 : index
    %c0_11 = arith.constant 0 : index
    %21 = vector.load %arg3[%c3, %c0_10, %c0_11] : memref<4x80x512xf32, #tpu.memory_space<vmem>>, vector<1x80x512xf32>
    %22 = vector.shape_cast %21 : vector<1x80x512xf32> to vector<80x512xf32>
    %cst_12 = arith.constant dense<0.000000e+00> : vector<16x512xf32>
    %23 = tpu.matmul %20, %22, %cst_12 {dimension_numbers = #tpu.dot_dimension_numbers<[1], [0], [0], [1], [0, 0, 1, 1], [], []>} : vector<16x80xf32>, vector<80x512xf32>, vector<16x512xf32> -> vector<16x512xf32>
    %24 = arith.addf %19, %23 : vector<16x512xf32>
    %25 = vector.extract_strided_slice %24 {offsets = [0, 0], sizes = [16, 256], strides = [1, 1]} : vector<16x512xf32> to vector<16x256xf32>
    %26 = vector.extract_strided_slice %24 {offsets = [0, 256], sizes = [16, 256], strides = [1, 1]} : vector<16x512xf32> to vector<16x256xf32>
    %27 = arith.mulf %25, %25 : vector<16x256xf32>
    %28 = arith.mulf %26, %26 : vector<16x256xf32>
    %29 = arith.addf %27, %28 : vector<16x256xf32>
    %30 = math.sqrt %29 : vector<16x256xf32>
    %cst_13 = arith.constant 9.99999968E-21 : f32
    %31 = vector.broadcast %cst_13 : f32 to vector<16x256xf32>
    %32 = arith.addf %30, %31 : vector<16x256xf32>
    %33 = math.log %32 : vector<16x256xf32>
    %c0_14 = arith.constant 0 : index
    %34 = memref.load %arg1[%c0_14] : memref<1xi32, #tpu.memory_space<smem>>
    %35 = arith.sitofp %34 : i32 to f32
    %c0_15 = arith.constant 0 : index
    %c0_16 = arith.constant 0 : index
    %36 = vector.load %arg4[%c0_15, %c0_16] : memref<1x256xf32, #tpu.memory_space<vmem>>, vector<1x256xf32>
    %37 = vector.broadcast %35 : f32 to vector<1x256xf32>
    %38 = arith.divf %36, %37 : vector<1x256xf32>
    %c0_17 = arith.constant 0 : index
    %c0_18 = arith.constant 0 : index
    %39 = vector.load %arg5[%c0_17, %c0_18] : memref<1x256xf32, #tpu.memory_space<vmem>>, vector<1x256xf32>
    %40 = vector.broadcast %35 : f32 to vector<1x256xf32>
    %41 = arith.mulf %40, %38 : vector<1x256xf32>
    %42 = arith.mulf %41, %38 : vector<1x256xf32>
    %43 = arith.subf %39, %42 : vector<1x256xf32>
    %cst_19 = arith.constant 1.000000e+00 : f32
    %44 = arith.subf %35, %cst_19 : f32
    %cst_20 = arith.constant 1.000000e+00 : f32
    %45 = arith.maximumf %44, %cst_20 : f32
    %46 = vector.broadcast %45 : f32 to vector<1x256xf32>
    %47 = arith.divf %43, %46 : vector<1x256xf32>
    %cst_21 = arith.constant 0.000000e+00 : f32
    %48 = vector.broadcast %cst_21 : f32 to vector<1x256xf32>
    %49 = arith.maximumf %47, %48 : vector<1x256xf32>
    %50 = math.sqrt %49 : vector<1x256xf32>
    %cst_22 = arith.constant 9.99999974E-6 : f32
    %51 = vector.broadcast %cst_22 : f32 to vector<1x256xf32>
    %52 = arith.addf %50, %51 : vector<1x256xf32>
    %cst_23 = arith.constant 1.000000e+00 : f32
    %53 = vector.broadcast %cst_23 : f32 to vector<1x256xf32>
    %54 = arith.divf %53, %52 : vector<1x256xf32>
    %55 = tpu.iota {dimensions = array<i32: 0>} : vector<16x256xi32>
    %56 = vector.broadcast %1 : i32 to vector<16x256xi32>
    %57 = arith.addi %56, %55 : vector<16x256xi32>
    %58 = vector.broadcast %34 : i32 to vector<16x256xi32>
    %59 = arith.cmpi slt, %57, %58 : vector<16x256xi32>
    %60 = vector.broadcast %38 : vector<1x256xf32> to vector<16x256xf32>
    %61 = arith.subf %33, %60 : vector<16x256xf32>
    %62 = vector.broadcast %54 : vector<1x256xf32> to vector<16x256xf32>
    %63 = arith.mulf %61, %62 : vector<16x256xf32>
    %cst_24 = arith.constant 0.000000e+00 : f32
    %64 = vector.broadcast %cst_24 : f32 to vector<16x256xf32>
    %65 = arith.select %59, %63, %64 : vector<16x256xi1>, vector<16x256xf32>
    %c0_25 = arith.constant 0 : index
    %c0_26 = arith.constant 0 : index
    %66 = vector.load %arg6[%c0_25, %c0_26] : memref<16x256xf32, #tpu.memory_space<vmem>>, vector<16x256xf32>
    tpu.vector_store %arg6[%c0_25, %c0_26], %65 {strides = array<i32>} : memref<16x256xf32, #tpu.memory_space<vmem>>, vector<16x256xf32>,
    return
  }
  func.func @transform_0(%arg0: i32) -> i32 {
    %c0_i32 = arith.constant 0 : i32
    %c0_i32_0 = arith.constant 0 : i32
    return %c0_i32 : i32
  }
  func.func @transform_1(%arg0: i32) -> (i32, i32) {
    %c0_i32 = arith.constant 0 : i32
    %c0_i32_0 = arith.constant 0 : i32
    %c0_i32_1 = arith.constant 0 : i32
    return %c0_i32, %c0_i32_0 : i32, i32
  }
  func.func @transform_2(%arg0: i32) -> (i32, i32, i32) {
    %c0_i32 = arith.constant 0 : i32
    %c0_i32_0 = arith.constant 0 : i32
    %c0_i32_1 = arith.constant 0 : i32
    %c0_i32_2 = arith.constant 0 : i32
    return %c0_i32, %c0_i32_0, %c0_i32_1 : i32, i32, i32
  }
  func.func @transform_3(%arg0: i32) -> (i32, i32) {
    %c0_i32 = arith.constant 0 : i32
    %c0_i32_0 = arith.constant 0 : i32
    %c0_i32_1 = arith.constant 0 : i32
    return %c0_i32, %c0_i32_0 : i32, i32
  }
  func.func @transform_4(%arg0: i32) -> (i32, i32) {
    %c0_i32 = arith.constant 0 : i32
    %c0_i32_0 = arith.constant 0 : i32
    %c0_i32_1 = arith.constant 0 : i32
    return %c0_i32, %c0_i32_0 : i32, i32
  }
  func.func @transform_5(%arg0: i32) -> (i32, i32) {
    %c0_i32 = arith.constant 0 : i32
    %c0_i32_0 = arith.constant 0 : i32
    return %arg0, %c0_i32 : i32, i32
  }
}

</mosaic_0001>

<bundles_post_ra>
// kernel: audio_preprocessing.2
= control target key start
LH: loop header
LB: loop body
LE: loop exit
PB: predicated region body
PF: predicated region fallthrough
CT: control target
= control target key end

     0   :  { %v1171_v3 = vmov 0.0   ;;  %vm683_vm0 = vcmask 1044480   ;;  %vm106_vm1 = vcmask 1046528   ;;  %vm112_vm2 = vcmask 654336   ;;  %s1793_s2 = inlined_call_operand.vmem [shape: f32[4,80,512], index: 2, kind: input, shape index: {}]   ;;  %s1794_s1 = inlined_call_operand.vmem [shape: f32[24,80], index: 1, kind: input, shape index: {}]   ;;  %s1795_s3 = inlined_call_operand.vmem [shape: f32[1,256], index: 3, kind: output, shape index: {0}]   ;;  %s1796_s4 = inlined_call_operand.vmem [shape: f32[1,256], index: 4, kind: output, shape index: {1}]   ;;  %s1797_s0 = inlined_call_operand.<no memory space> [shape: s32[1], index: 0, kind: input, shape index: {}]  }
   0x1   :  { %v1054_v0 = vld [vmem:[%s1793_s2 + $0x268] sm:$0xff]  ;;  %v1056_v1 = vld [vmem:[%s1793_s2 + $0x278] sm:$0xff]  ;;  %v1053_v2 = vld [vmem:[%s1793_s2 + $0x260] sm:$0xff]  ;;  %181 = vmatprep.mubr.f32.mxu0 %v1171_v3  ;;  %258 = vmatprep.mubr.f32.mxu1 %v1171_v3  ;;  %vm470_vm3 = vcmask 1045504  }
   0x2   :  { %129 = vmatprep.subr.mxu0 %v1054_v0  ;;  %206 = vmatprep.subr.mxu1 %v1056_v1  ;;  %v1055_v4 = vld [vmem:[%s1793_s2 + $0x270] sm:$0xff]  ;;  %v1050_v5 = vld [vmem:[%s1793_s2 + $0x248] sm:$0xff]  ;;  %v1052_v6 = vld [vmem:[%s1793_s2 + $0x258] sm:$0xff] }
   0x3   :  { %130 = vmatpush1.msra.mxu0 %v1053_v2  ;;  %207 = vmatpush1.msra.mxu1 %v1055_v4  ;;  %v1049_v7 = vld [vmem:[%s1793_s2 + $0x240] sm:$0xff]  ;;  %v1051_v8 = vld [vmem:[%s1793_s2 + $0x250] sm:$0xff]  ;;  %v1046_v9 = vld [vmem:[%s1793_s2 + $0x228] sm:$0xff] }
   0x4   :  { %131 = vmatprep.subr.mxu0 %v1050_v5  ;;  %208 = vmatprep.subr.mxu1 %v1052_v6  ;;  %v1048_v10 = vld [vmem:[%s1793_s2 + $0x238] sm:$0xff]  ;;  %v1045_v11 = vld [vmem:[%s1793_s2 + $0x220] sm:$0xff]  ;;  %v1047_v12 = vld [vmem:[%s1793_s2 + $0x230] sm:$0xff] }
   0x5   :  { %132 = vmatpush1.msra.mxu0 %v1049_v7  ;;  %209 = vmatpush1.msra.mxu1 %v1051_v8  ;;  %v1042_v13 = vld [vmem:[%s1793_s2 + $0x208] sm:$0xff]  ;;  %v1044_v14 = vld [vmem:[%s1793_s2 + $0x218] sm:$0xff]  ;;  %v1041_v15 = vld [vmem:[%s1793_s2 + $0x200] sm:$0xff] }
   0x6   :  { %133 = vmatprep.subr.mxu0 %v1046_v9  ;;  %210 = vmatprep.subr.mxu1 %v1048_v10  ;;  %v1043_v16 = vld [vmem:[%s1793_s2 + $0x210] sm:$0xff]  ;;  %v1038_v17 = vld [vmem:[%s1793_s2 + $0x1e8] sm:$0xff]  ;;  %v1040_v18 = vld [vmem:[%s1793_s2 + $0x1f8] sm:$0xff] }
   0x7   :  { %134 = vmatpush1.msra.mxu0 %v1045_v11  ;;  %211 = vmatpush1.msra.mxu1 %v1047_v12  ;;  %v1037_v19 = vld [vmem:[%s1793_s2 + $0x1e0] sm:$0xff]  ;;  %v1039_v20 = vld [vmem:[%s1793_s2 + $0x1f0] sm:$0xff]  ;;  %v1034_v21 = vld [vmem:[%s1793_s2 + $0x1c8] sm:$0xff] }
   0x8   :  { %135 = vmatprep.subr.mxu0 %v1042_v13  ;;  %212 = vmatprep.subr.mxu1 %v1044_v14  ;;  %v1036_v22 = vld [vmem:[%s1793_s2 + $0x1d8] sm:$0xff]  ;;  %v1033_v23 = vld [vmem:[%s1793_s2 + $0x1c0] sm:$0xff]  ;;  %v1035_v24 = vld [vmem:[%s1793_s2 + $0x1d0] sm:$0xff] }
   0x9   :  { %136 = vmatpush1.msra.mxu0 %v1041_v15  ;;  %213 = vmatpush1.msra.mxu1 %v1043_v16  ;;  %v1030_v25 = vld [vmem:[%s1793_s2 + $0x1a8] sm:$0xff]  ;;  %v1032_v26 = vld [vmem:[%s1793_s2 + $0x1b8] sm:$0xff]  ;;  %v1029_v27 = vld [vmem:[%s1793_s2 + $0x1a0] sm:$0xff] }
   0xa   :  { %137 = vmatprep.subr.mxu0 %v1038_v17  ;;  %214 = vmatprep.subr.mxu1 %v1040_v18  ;;  %v1031_v28 = vld [vmem:[%s1793_s2 + $0x1b0] sm:$0xff]  ;;  %v1026_v29 = vld [vmem:[%s1793_s2 + $0x188] sm:$0xff]  ;;  %v1028_v30 = vld [vmem:[%s1793_s2 + $0x198] sm:$0xff] }
   0xb   :  { %138 = vmatpush1.msra.mxu0 %v1037_v19  ;;  %215 = vmatpush1.msra.mxu1 %v1039_v20  ;;  %v1025_v31 = vld [vmem:[%s1793_s2 + $0x180] sm:$0xff]  ;;  %v1027_v32 = vld [vmem:[%s1793_s2 + $0x190] sm:$0xff]  ;;  %v1304_v34 = vld [vmem:[%s1794_s1 + $0x8] sm:$0xff] }
   0xc   :  { %139 = vmatprep.subr.mxu0 %v1034_v21  ;;  %216 = vmatprep.subr.mxu1 %v1036_v22  ;;  %v1299_v33 = vld [vmem:[%s1794_s1] sm:$0xff]  ;;  %v1022_v35 = vld [vmem:[%s1793_s2 + $0x168] sm:$0xff]  ;;  %v1024_v36 = vld [vmem:[%s1793_s2 + $0x178] sm:$0xff]  ;;  %v108_v38 = vrot.slane %v1304_v34, 1  ;;  %v685_v42 = vrot.slane %v1304_v34, 3 }
   0xd   :  { %140 = vmatpush1.msra.mxu0 %v1033_v23  ;;  %217 = vmatpush1.msra.mxu1 %v1035_v24  ;;  %v107_v37 = vrot.slane %v1299_v33, 1  ;;  %v1021_v39 = vld [vmem:[%s1793_s2 + $0x160] sm:$0xff]  ;;  %v1023_v40 = vld [vmem:[%s1793_s2 + $0x170] sm:$0xff]  ;;  %v684_v41 = vrot.slane %v1299_v33, 3  ;;  %v1018_v43 = vld [vmem:[%s1793_s2 + $0x148] sm:$0xff] }
   0xe   :  { %141 = vmatprep.subr.mxu0 %v1030_v25  ;;  %218 = vmatprep.subr.mxu1 %v1032_v26  ;;  %v1020_v44 = vld [vmem:[%s1793_s2 + $0x158] sm:$0xff]  ;;  %v1017_v45 = vld [vmem:[%s1793_s2 + $0x140] sm:$0xff]  ;;  %v1019_v46 = vld [vmem:[%s1793_s2 + $0x150] sm:$0xff] }
   0xf   :  { %142 = vmatpush1.msra.mxu0 %v1029_v27  ;;  %219 = vmatpush1.msra.mxu1 %v1031_v28  ;;  %v1337_v47 = vsel %vm683_vm0, %v684_v41, %v685_v42  ;;  %v109_v48 = vsel %vm106_vm1, %v107_v37, %v108_v38  ;;  %v59_v49 = vld [vmem:[%s1793_s2 + $0x128] sm:$0xff]  ;;  %v61_v50 = vld [vmem:[%s1793_s2 + $0x138] sm:$0xff]  ;;  %v58_v51 = vld [vmem:[%s1793_s2 + $0x120] sm:$0xff] }
  0x10   :  { %143 = vmatprep.subr.mxu0 %v1026_v29  ;;  %220 = vmatprep.subr.mxu1 %v1028_v30  ;;  %v60_v52 = vld [vmem:[%s1793_s2 + $0x130] sm:$0xff]  ;;  %v55_v53 = vld [vmem:[%s1793_s2 + $0x108] sm:$0xff]  ;;  %v57_v54 = vld [vmem:[%s1793_s2 + $0x118] sm:$0xff] }
  0x11   :  { %144 = vmatpush1.msra.mxu0 %v1025_v31  ;;  %221 = vmatpush1.msra.mxu1 %v1027_v32  ;;  %v54_v55 = vld [vmem:[%s1793_s2 + $0x100] sm:$0xff]  ;;  %v56_v56 = vld [vmem:[%s1793_s2 + $0x110] sm:$0xff]  ;;  %v51_v57 = vld [vmem:[%s1793_s2 + $0xe8] sm:$0xff] }
  0x12   :  { %145 = vmatprep.subr.mxu0 %v1022_v35  ;;  %222 = vmatprep.subr.mxu1 %v1024_v36  ;;  %v53_v58 = vld [vmem:[%s1793_s2 + $0xf8] sm:$0xff]  ;;  %v50_v59 = vld [vmem:[%s1793_s2 + $0xe0] sm:$0xff]  ;;  %v52_v60 = vld [vmem:[%s1793_s2 + $0xf0] sm:$0xff] }
  0x13   :  { %146 = vmatpush1.msra.mxu0 %v1021_v39  ;;  %223 = vmatpush1.msra.mxu1 %v1023_v40  ;;  %v47_v61 = vld [vmem:[%s1793_s2 + $0xc8] sm:$0xff]  ;;  %v49_v62 = vld [vmem:[%s1793_s2 + $0xd8] sm:$0xff]  ;;  %v46_v63 = vld [vmem:[%s1793_s2 + $0xc0] sm:$0xff] }
  0x14   :  { %147 = vmatprep.subr.mxu0 %v1018_v43  ;;  %224 = vmatprep.subr.mxu1 %v1020_v44  ;;  %v48_v0 = vld [vmem:[%s1793_s2 + $0xd0] sm:$0xff]  ;;  %v43_v1 = vld [vmem:[%s1793_s2 + $0xa8] sm:$0xff]  ;;  %v45_v2 = vld [vmem:[%s1793_s2 + $0xb8] sm:$0xff] }
  0x15   :  { %148 = vmatpush1.msra.mxu0 %v1017_v45  ;;  %225 = vmatpush1.msra.mxu1 %v1019_v46  ;;  %v42_v4 = vld [vmem:[%s1793_s2 + $0xa0] sm:$0xff]  ;;  %v44_v5 = vld [vmem:[%s1793_s2 + $0xb0] sm:$0xff]  ;;  %v39_v7 = vld [vmem:[%s1793_s2 + $0x88] sm:$0xff] }
  0x16   :  { %1057 = vmatmul.mubr.msk.f32.vlgmr.msra.gmra.mxu0 %vm112_vm2, %v109_v48  ;;  %1059 = vmatmul.mubr.msk.f32.vlgmr.msra.gmra.mxu1 %vm112_vm2, %v109_v48  ;;  %v1407_v6 = vld [vmem:[%s1794_s1 + $0x10] sm:$0xff]  ;;  %v41_v8 = vld [vmem:[%s1793_s2 + $0x98] sm:$0xff]  ;;  %v38_v9 = vld [vmem:[%s1793_s2 + $0x80] sm:$0xff] }
  0x17   :  { %287 = vmatprep.subr.mxu0 %v59_v49  ;;  %364 = vmatprep.subr.mxu1 %v61_v50  ;;  %v40_v10 = vld [vmem:[%s1793_s2 + $0x90] sm:$0xff]  ;;  %v35_v11 = vld [vmem:[%s1793_s2 + $0x68] sm:$0xff]  ;;  %v37_v12 = vld [vmem:[%s1793_s2 + $0x78] sm:$0xff]  ;;  %v110_v13 = vrot.slane %v1407_v6, 1 }
  0x18   :  { %288 = vmatpush1.msra.mxu0 %v58_v51  ;;  %365 = vmatpush1.msra.mxu1 %v60_v52  ;;  %v34_v14 = vld [vmem:[%s1793_s2 + $0x60] sm:$0xff]  ;;  %v36_v15 = vld [vmem:[%s1793_s2 + $0x70] sm:$0xff]  ;;  %v31_v16 = vld [vmem:[%s1793_s2 + $0x48] sm:$0xff] }
  0x19   :  { %289 = vmatprep.subr.mxu0 %v55_v53  ;;  %366 = vmatprep.subr.mxu1 %v57_v54  ;;  %v33_v17 = vld [vmem:[%s1793_s2 + $0x58] sm:$0xff]  ;;  %v111_v18 = vsel %vm106_vm1, %v108_v38, %v110_v13  ;;  %v30_v19 = vld [vmem:[%s1793_s2 + $0x40] sm:$0xff]  ;;  %v32_v20 = vld [vmem:[%s1793_s2 + $0x50] sm:$0xff] }
  0x1a   :  { %290 = vmatpush1.msra.mxu0 %v54_v55  ;;  %367 = vmatpush1.msra.mxu1 %v56_v56  ;;  %v27_v21 = vld [vmem:[%s1793_s2 + $0x28] sm:$0xff]  ;;  %v29_v22 = vld [vmem:[%s1793_s2 + $0x38] sm:$0xff]  ;;  %v26_v23 = vld [vmem:[%s1793_s2 + $0x20] sm:$0xff] }
  0x1b   :  { %291 = vmatprep.subr.mxu0 %v51_v57  ;;  %368 = vmatprep.subr.mxu1 %v53_v58  ;;  %v28_v24 = vld [vmem:[%s1793_s2 + $0x30] sm:$0xff]  ;;  %v23_v25 = vld [vmem:[%s1793_s2 + $0x8] sm:$0xff]  ;;  %v25_v26 = vld [vmem:[%s1793_s2 + $0x18] sm:$0xff] }
  0x1c   :  { %292 = vmatpush1.msra.mxu0 %v50_v59  ;;  %369 = vmatpush1.msra.mxu1 %v52_v60  ;;  %v22_v27 = vld [vmem:[%s1793_s2] sm:$0xff]  ;;  %v24_v28 = vld [vmem:[%s1793_s2 + $0x10] sm:$0xff]  ;;  %v1102_v29 = vld [vmem:[%s1793_s2 + $0x3a8] sm:$0xff] }
  0x1d   :  { %293 = vmatprep.subr.mxu0 %v47_v61  ;;  %370 = vmatprep.subr.mxu1 %v49_v62  ;;  %v1104_v30 = vld [vmem:[%s1793_s2 + $0x3b8] sm:$0xff]  ;;  %v1101_v31 = vld [vmem:[%s1793_s2 + $0x3a0] sm:$0xff]  ;;  %v1103_v32 = vld [vmem:[%s1793_s2 + $0x3b0] sm:$0xff] }
  0x1e   :  { %294 = vmatpush1.msra.mxu0 %v46_v63  ;;  %371 = vmatpush1.msra.mxu1 %v48_v0  ;;  %v1098_v35 = vld [vmem:[%s1793_s2 + $0x388] sm:$0xff]  ;;  %v1100_v36 = vld [vmem:[%s1793_s2 + $0x398] sm:$0xff]  ;;  %v1097_v37 = vld [vmem:[%s1793_s2 + $0x380] sm:$0xff] }
  0x1f   :  { %295 = vmatprep.subr.mxu0 %v43_v1  ;;  %372 = vmatprep.subr.mxu1 %v45_v2  ;;  %v1099_v38 = vld [vmem:[%s1793_s2 + $0x390] sm:$0xff]  ;;  %v1094_v39 = vld [vmem:[%s1793_s2 + $0x368] sm:$0xff]  ;;  %v1096_v40 = vld [vmem:[%s1793_s2 + $0x378] sm:$0xff] }
  0x20   :  { %296 = vmatpush1.msra.mxu0 %v42_v4  ;;  %373 = vmatpush1.msra.mxu1 %v44_v5  ;;  %v1093_v41 = vld [vmem:[%s1793_s2 + $0x360] sm:$0xff]  ;;  %v1095_v43 = vld [vmem:[%s1793_s2 + $0x370] sm:$0xff]  ;;  %v1090_v44 = vld [vmem:[%s1793_s2 + $0x348] sm:$0xff] }
  0x21   :  { %297 = vmatprep.subr.mxu0 %v39_v7  ;;  %374 = vmatprep.subr.mxu1 %v41_v8  ;;  %v1092_v45 = vld [vmem:[%s1793_s2 + $0x358] sm:$0xff]  ;;  %v1089_v46 = vld [vmem:[%s1793_s2 + $0x340] sm:$0xff]  ;;  %v1091_v48 = vld [vmem:[%s1793_s2 + $0x350] sm:$0xff]  ;;  %v471_v7 = vrot.slane %v1299_v33, 2  ;;  %v472_v8 = vrot.slane %v1304_v34, 2 }
  0x22   :  { %298 = vmatpush1.msra.mxu0 %v38_v9  ;;  %375 = vmatpush1.msra.mxu1 %v40_v10  ;;  %v1086_v49 = vld [vmem:[%s1793_s2 + $0x328] sm:$0xff]  ;;  %v1088_v50 = vld [vmem:[%s1793_s2 + $0x338] sm:$0xff]  ;;  %v1085_v51 = vld [vmem:[%s1793_s2 + $0x320] sm:$0xff] }
  0x23   :  { %299 = vmatprep.subr.mxu0 %v35_v11  ;;  %376 = vmatprep.subr.mxu1 %v37_v12  ;;  %v1087_v52 = vld [vmem:[%s1793_s2 + $0x330] sm:$0xff]  ;;  %v1082_v53 = vld [vmem:[%s1793_s2 + $0x308] sm:$0xff]  ;;  %v1084_v54 = vld [vmem:[%s1793_s2 + $0x318] sm:$0xff]  ;;  %v473_v12 = vsel %vm470_vm3, %v471_v7, %v472_v8 }
  0x24   :  { %300 = vmatpush1.msra.mxu0 %v34_v14  ;;  %377 = vmatpush1.msra.mxu1 %v36_v15  ;;  %v1081_v55 = vld [vmem:[%s1793_s2 + $0x300] sm:$0xff]  ;;  %v1083_v56 = vld [vmem:[%s1793_s2 + $0x310] sm:$0xff]  ;;  %v1078_v57 = vld [vmem:[%s1793_s2 + $0x2e8] sm:$0xff] }
  0x25   :  { %187 = vmatprep.mubr.f32.mxu0 %v1171_v3  ;;  %264 = vmatprep.mubr.f32.mxu1 %v1171_v3  ;;  %v1080_v58 = vld [vmem:[%s1793_s2 + $0x2f8] sm:$0xff]  ;;  %v1077_v59 = vld [vmem:[%s1793_s2 + $0x2e0] sm:$0xff]  ;;  %v1079_v60 = vld [vmem:[%s1793_s2 + $0x2f0] sm:$0xff] }
  0x26   :  { %301 = vmatprep.subr.mxu0 %v31_v16  ;;  %378 = vmatprep.subr.mxu1 %v33_v17  ;;  %v1074_v61 = vld [vmem:[%s1793_s2 + $0x2c8] sm:$0xff]  ;;  %v1076_v62 = vld [vmem:[%s1793_s2 + $0x2d8] sm:$0xff]  ;;  %v1073_v63 = vld [vmem:[%s1793_s2 + $0x2c0] sm:$0xff]  ;;  %v474_v17 = vrot.slane %v1407_v6, 2 }
  0x27   :  { %1058 = vmatmul.mubr.msk.f32.gmra.mxu0 %vm112_vm2, %v111_v18  ;;  %1060 = vmatmul.mubr.msk.f32.gmra.mxu1 %vm112_vm2, %v111_v18  ;;  %v1075_v0 = vld [vmem:[%s1793_s2 + $0x2d0] sm:$0xff]  ;;  %v1070_v1 = vld [vmem:[%s1793_s2 + $0x2a8] sm:$0xff]  ;;  %v1072_v2 = vld [vmem:[%s1793_s2 + $0x2b8] sm:$0xff] }
  0x28   :  { %302 = vmatpush1.msra.mxu0 %v30_v19  ;;  %379 = vmatpush1.msra.mxu1 %v32_v20  ;;  %v1069_v4 = vld [vmem:[%s1793_s2 + $0x2a0] sm:$0xff]  ;;  %v1071_v5 = vld [vmem:[%s1793_s2 + $0x2b0] sm:$0xff]  ;;  %v1066_v9 = vld [vmem:[%s1793_s2 + $0x288] sm:$0xff] }
  0x29   :  { %303 = vmatprep.subr.mxu0 %v27_v21  ;;  %380 = vmatprep.subr.mxu1 %v29_v22  ;;  %v1068_v10 = vld [vmem:[%s1793_s2 + $0x298] sm:$0xff]  ;;  %v1065_v11 = vld [vmem:[%s1793_s2 + $0x280] sm:$0xff]  ;;  %v1146_v13 = vld [vmem:[%s1793_s2 + $0x4e8] sm:$0xff]  ;;  %v475_v22 = vsel %vm470_vm3, %v472_v8, %v474_v17 }
  0x2a   :  { %304 = vmatpush1.msra.mxu0 %v26_v23  ;;  %381 = vmatpush1.msra.mxu1 %v28_v24  ;;  %v1148_v14 = vld [vmem:[%s1793_s2 + $0x4f8] sm:$0xff]  ;;  %v1145_v15 = vld [vmem:[%s1793_s2 + $0x4e0] sm:$0xff]  ;;  %v1147_v16 = vld [vmem:[%s1793_s2 + $0x4f0] sm:$0xff] }
  0x2b   :  { %305 = vmatprep.subr.mxu0 %v23_v25  ;;  %382 = vmatprep.subr.mxu1 %v25_v26  ;;  %v1142_v18 = vld [vmem:[%s1793_s2 + $0x4c8] sm:$0xff]  ;;  %v1144_v19 = vld [vmem:[%s1793_s2 + $0x4d8] sm:$0xff]  ;;  %v1141_v20 = vld [vmem:[%s1793_s2 + $0x4c0] sm:$0xff] }
  0x2c   :  { %306 = vmatpush1.msra.mxu0 %v22_v27  ;;  %339 = vmatprep.mubr.f32.mxu0 %v1171_v3  ;;  %v1143_v21 = vld [vmem:[%s1793_s2 + $0x4d0] sm:$0xff]  ;;  %v1138_v23 = vld [vmem:[%s1793_s2 + $0x4a8] sm:$0xff]  ;;  %v1140_v24 = vld [vmem:[%s1793_s2 + $0x4b8] sm:$0xff] }
  0x2d   :  { %383 = vmatpush1.msra.mxu1 %v24_v28  ;;  %416 = vmatprep.mubr.f32.mxu1 %v1171_v3  ;;  %v1137_v25 = vld [vmem:[%s1793_s2 + $0x4a0] sm:$0xff]  ;;  %v1139_v26 = vld [vmem:[%s1793_s2 + $0x4b0] sm:$0xff]  ;;  %v1134_v27 = vld [vmem:[%s1793_s2 + $0x488] sm:$0xff] }
  0x2e   :  { %1061 = vmatmul.mubr.msk.f32.vlgmr.msra.gmra.mxu0 %vm112_vm2, %v1299_v33  ;;  %1063 = vmatmul.mubr.msk.f32.vlgmr.msra.gmra.mxu1 %vm112_vm2, %v1299_v33  ;;  %v1067_v33 = vld [vmem:[%s1793_s2 + $0x290] sm:$0xff]  ;;  %v1136_v28 = vld [vmem:[%s1793_s2 + $0x498] sm:$0xff] }
  0x2f   :  { %492 = vmatprep.subr.mxu0 %v1102_v29  ;;  %569 = vmatprep.subr.mxu1 %v1104_v30  ;;  %v1133_v29 = vld [vmem:[%s1793_s2 + $0x480] sm:$0xff]  ;;  %v1135_v30 = vld [vmem:[%s1793_s2 + $0x490] sm:$0xff] }
  0x30   :  { %493 = vmatpush1.msra.mxu0 %v1101_v31  ;;  %570 = vmatpush1.msra.mxu1 %v1103_v32  ;;  %v1130_v31 = vld [vmem:[%s1793_s2 + $0x468] sm:$0xff]  ;;  %v1132_v32 = vld [vmem:[%s1793_s2 + $0x478] sm:$0xff] }
  0x31   :  { %494 = vmatprep.subr.mxu0 %v1098_v35  ;;  %571 = vmatprep.subr.mxu1 %v1100_v36  ;;  %v1129_v35 = vld [vmem:[%s1793_s2 + $0x460] sm:$0xff]  ;;  %v1131_v36 = vld [vmem:[%s1793_s2 + $0x470] sm:$0xff] }
  0x32   :  { %345 = vmatprep.mubr.f32.mxu0 %v1171_v3  ;;  %422 = vmatprep.mubr.f32.mxu1 %v1171_v3 }
  0x33   :  { %495 = vmatpush1.msra.mxu0 %v1097_v37  ;;  %572 = vmatpush1.msra.mxu1 %v1099_v38  ;;  %v1126_v37 = vld [vmem:[%s1793_s2 + $0x448] sm:$0xff]  ;;  %v1128_v38 = vld [vmem:[%s1793_s2 + $0x458] sm:$0xff] }
  0x34   :  { %1062 = vmatmul.mubr.msk.f32.gmra.mxu0 %vm112_vm2, %v1304_v34  ;;  %1064 = vmatmul.mubr.msk.f32.gmra.mxu1 %vm112_vm2, %v1304_v34 }
  0x35   :  { %496 = vmatprep.subr.mxu0 %v1094_v39  ;;  %573 = vmatprep.subr.mxu1 %v1096_v40  ;;  %v1125_v39 = vld [vmem:[%s1793_s2 + $0x440] sm:$0xff]  ;;  %v1127_v40 = vld [vmem:[%s1793_s2 + $0x450] sm:$0xff] }
  0x36   :  { %497 = vmatpush1.msra.mxu0 %v1093_v41  ;;  %574 = vmatpush1.msra.mxu1 %v1095_v43  ;;  %v1122_v41 = vld [vmem:[%s1793_s2 + $0x428] sm:$0xff]  ;;  %v1124_v43 = vld [vmem:[%s1793_s2 + $0x438] sm:$0xff] }
  0x37   :  { %498 = vmatprep.subr.mxu0 %v1090_v44  ;;  %575 = vmatprep.subr.mxu1 %v1092_v45  ;;  %v1121_v44 = vld [vmem:[%s1793_s2 + $0x420] sm:$0xff]  ;;  %v1123_v45 = vld [vmem:[%s1793_s2 + $0x430] sm:$0xff] }
  0x38   :  { %499 = vmatpush1.msra.mxu0 %v1089_v46  ;;  %576 = vmatpush1.msra.mxu1 %v1091_v48  ;;  %v1118_v46 = vld [vmem:[%s1793_s2 + $0x408] sm:$0xff]  ;;  %v1120_v48 = vld [vmem:[%s1793_s2 + $0x418] sm:$0xff] }
  0x39   :  { %500 = vmatprep.subr.mxu0 %v1086_v49  ;;  %577 = vmatprep.subr.mxu1 %v1088_v50  ;;  %v1117_v49 = vld [vmem:[%s1793_s2 + $0x400] sm:$0xff]  ;;  %v1119_v50 = vld [vmem:[%s1793_s2 + $0x410] sm:$0xff] }
  0x3a   :  { %501 = vmatpush1.msra.mxu0 %v1085_v51  ;;  %578 = vmatpush1.msra.mxu1 %v1087_v52  ;;  %v1114_v51 = vld [vmem:[%s1793_s2 + $0x3e8] sm:$0xff]  ;;  %v1116_v52 = vld [vmem:[%s1793_s2 + $0x3f8] sm:$0xff] }
  0x3b   :  { %502 = vmatprep.subr.mxu0 %v1082_v53  ;;  %579 = vmatprep.subr.mxu1 %v1084_v54  ;;  %v1113_v53 = vld [vmem:[%s1793_s2 + $0x3e0] sm:$0xff]  ;;  %v1115_v54 = vld [vmem:[%s1793_s2 + $0x3f0] sm:$0xff] }
  0x3c   :  { %503 = vmatpush1.msra.mxu0 %v1081_v55  ;;  %580 = vmatpush1.msra.mxu1 %v1083_v56  ;;  %v1110_v55 = vld [vmem:[%s1793_s2 + $0x3c8] sm:$0xff]  ;;  %v1112_v56 = vld [vmem:[%s1793_s2 + $0x3d8] sm:$0xff] }
  0x3d   :  { %504 = vmatprep.subr.mxu0 %v1078_v57  ;;  %581 = vmatprep.subr.mxu1 %v1080_v58  ;;  %v1109_v57 = vld [vmem:[%s1793_s2 + $0x3c0] sm:$0xff]  ;;  %v1111_v58 = vld [vmem:[%s1793_s2 + $0x3d0] sm:$0xff] }
  0x3e   :  { %505 = vmatpush1.msra.mxu0 %v1077_v59  ;;  %582 = vmatpush1.msra.mxu1 %v1079_v60  ;;  %v687_v59 = vrot.slane %v1407_v6, 3  ;;  %v907_v60 = vlaneseq }
  0x3f   :  { %506 = vmatprep.subr.mxu0 %v1074_v61  ;;  %583 = vmatprep.subr.mxu1 %v1076_v62 }
  0x40   :  { %507 = vmatpush1.msra.mxu0 %v1073_v63  ;;  %584 = vmatpush1.msra.mxu1 %v1075_v0  ;;  %v688_v6 = vsel %vm683_vm0, %v685_v42, %v687_v59  ;;  %vm1757_vm4 = vcmp.lt.s32.totalorder %v907_v60, 256 }
  0x41   :  { %508 = vmatprep.subr.mxu0 %v1070_v1  ;;  %585 = vmatprep.subr.mxu1 %v1072_v2  ;;  %929 = vst.msk [vmem:[%s1795_s3] sm:$0x3] %vm1757_vm4, %v1171_v3  ;;  %930 = vst.msk [vmem:[%s1796_s4] sm:$0x3] %vm1757_vm4, %v1171_v3 }
  0x42   :  { %509 = vmatpush1.msra.mxu0 %v1069_v4  ;;  %586 = vmatpush1.msra.mxu1 %v1071_v5 }
  0x43   :  { %510 = vmatprep.subr.mxu0 %v1066_v9  ;;  %587 = vmatprep.subr.mxu1 %v1068_v10 }
  0x44   :  { %511 = vmatpush1.msra.mxu0 %v1065_v11  ;;  %544 = vmatprep.mubr.f32.mxu0 %v1171_v3 }
  0x45   :  { %588 = vmatpush1.msra.mxu1 %v1067_v33  ;;  %621 = vmatprep.mubr.f32.mxu1 %v1171_v3 }
  0x46   :  { %1105 = vmatmul.mubr.msk.f32.vlgmr.msra.gmra.mxu0 %vm112_vm2, %v473_v12  ;;  %1107 = vmatmul.mubr.msk.f32.vlgmr.msra.gmra.mxu1 %vm112_vm2, %v473_v12 }
  0x47   :  { %705 = vmatprep.subr.mxu0 %v1146_v13  ;;  %782 = vmatprep.subr.mxu1 %v1148_v14 }
  0x48   :  { %706 = vmatpush1.msra.mxu0 %v1145_v15  ;;  %783 = vmatpush1.msra.mxu1 %v1147_v16 }
  0x49   :  { %707 = vmatprep.subr.mxu0 %v1142_v18  ;;  %784 = vmatprep.subr.mxu1 %v1144_v19 }
  0x4a   :  { %550 = vmatprep.mubr.f32.mxu0 %v1171_v3  ;;  %627 = vmatprep.mubr.f32.mxu1 %v1171_v3 }
  0x4b   :  { %708 = vmatpush1.msra.mxu0 %v1141_v20  ;;  %785 = vmatpush1.msra.mxu1 %v1143_v21 }
  0x4c   :  { %1106 = vmatmul.mubr.msk.f32.gmra.mxu0 %vm112_vm2, %v475_v22  ;;  %1108 = vmatmul.mubr.msk.f32.gmra.mxu1 %vm112_vm2, %v475_v22 }
  0x4d   :  { %709 = vmatprep.subr.mxu0 %v1138_v23  ;;  %786 = vmatprep.subr.mxu1 %v1140_v24 }
  0x4e   :  { %710 = vmatpush1.msra.mxu0 %v1137_v25  ;;  %787 = vmatpush1.msra.mxu1 %v1139_v26 }
  0x4f   :  { %711 = vmatprep.subr.mxu0 %v1134_v27  ;;  %788 = vmatprep.subr.mxu1 %v1136_v28 }
  0x50   :  { %712 = vmatpush1.msra.mxu0 %v1133_v29  ;;  %789 = vmatpush1.msra.mxu1 %v1135_v30 }
  0x51   :  { %713 = vmatprep.subr.mxu0 %v1130_v31  ;;  %790 = vmatprep.subr.mxu1 %v1132_v32 }
  0x52   :  { %714 = vmatpush1.msra.mxu0 %v1129_v35  ;;  %791 = vmatpush1.msra.mxu1 %v1131_v36 }
  0x53   :  { %715 = vmatprep.subr.mxu0 %v1126_v37  ;;  %792 = vmatprep.subr.mxu1 %v1128_v38 }
  0x54   :  { %716 = vmatpush1.msra.mxu0 %v1125_v39  ;;  %793 = vmatpush1.msra.mxu1 %v1127_v40 }
  0x55   :  { %717 = vmatprep.subr.mxu0 %v1122_v41  ;;  %794 = vmatprep.subr.mxu1 %v1124_v43 }
  0x56   :  { %718 = vmatpush1.msra.mxu0 %v1121_v44  ;;  %795 = vmatpush1.msra.mxu1 %v1123_v45 }
  0x57   :  { %719 = vmatprep.subr.mxu0 %v1118_v46  ;;  %796 = vmatprep.subr.mxu1 %v1120_v48 }
  0x58   :  { %720 = vmatpush1.msra.mxu0 %v1117_v49  ;;  %797 = vmatpush1.msra.mxu1 %v1119_v50 }
  0x59   :  { %721 = vmatprep.subr.mxu0 %v1114_v51  ;;  %798 = vmatprep.subr.mxu1 %v1116_v52 }
  0x5a   :  { %722 = vmatpush1.msra.mxu0 %v1113_v53  ;;  %799 = vmatpush1.msra.mxu1 %v1115_v54 }
  0x5b   :  { %723 = vmatprep.subr.mxu0 %v1110_v55  ;;  %800 = vmatprep.subr.mxu1 %v1112_v56 }
  0x5c   :  { %724 = vmatpush1.msra.mxu0 %v1109_v57  ;;  %757 = vmatprep.mubr.f32.mxu0 %v1171_v3 }
  0x5d   :  { %801 = vmatpush1.msra.mxu1 %v1111_v58  ;;  %834 = vmatprep.mubr.f32.mxu1 %v1171_v3 }
  0x5e   :  { %1149 = vmatmul.mubr.msk.f32.vlgmr.msra.gmra.mxu0 %vm112_vm2, %v1337_v47  ;;  %1151 = vmatmul.mubr.msk.f32.vlgmr.msra.gmra.mxu1 %vm112_vm2, %v1337_v47 }
  0x5f   :  { %763 = vmatprep.mubr.f32.mxu0 %v1171_v3  ;;  %840 = vmatprep.mubr.f32.mxu1 %v1171_v3 }
  0x62   :  { %1150 = vmatmul.mubr.msk.f32.gmra.mxu0 %vm112_vm2, %v688_v6  ;;  %1152 = vmatmul.mubr.msk.f32.gmra.mxu1 %vm112_vm2, %v688_v6 }
  0xd6   :  { %v183_v34 = vpop.f32.mrf.mxu0  ;;  %v260_v42 = vpop.f32.mrf.mxu1 }
  0xd8   :  { %v185_v47 = vpop.f32.mrf.mxu0  ;;  %v262_v62 = vpop.f32.mrf.mxu1 }
  0xe7   :  { %v189_v63 = vpop.f32.mrf.mxu0  ;;  %v266_v0 = vpop.f32.mrf.mxu1 }
  0xe9   :  { %v191_v1 = vpop.f32.mrf.mxu0  ;;  %v268_v2 = vpop.f32.mrf.mxu1 }
  0xee   :  { %v341_v4 = vpop.f32.mrf.mxu0  ;;  %v418_v5 = vpop.f32.mrf.mxu1 }
  0xef   :  { %v342_v17 = vadd.f32 %v341_v4, %v183_v34  ;;  %v419_v18 = vadd.f32 %v418_v5, %v260_v42 }
  0xf0   :  { %v343_v7 = vpop.f32.mrf.mxu0  ;;  %v420_v8 = vpop.f32.mrf.mxu1 }
  0xf1   :  { %v344_v21 = vadd.f32 %v343_v7, %v185_v47  ;;  %v421_v22 = vadd.f32 %v420_v8, %v262_v62 }
  0xf4   :  { %v347_v9 = vpop.f32.mrf.mxu0  ;;  %v424_v10 = vpop.f32.mrf.mxu1 }
  0xf5   :  { %v348_v25 = vadd.f32 %v347_v9, %v189_v63  ;;  %v425_v32 = vadd.f32 %v424_v10, %v266_v0 }
  0xf6   :  { %v349_v11 = vpop.f32.mrf.mxu0  ;;  %v426_v33 = vpop.f32.mrf.mxu1 }
  0xf7   :  { %v350_v43 = vadd.f32 %v349_v11, %v191_v1  ;;  %v427_v44 = vadd.f32 %v426_v33, %v268_v2 }
 0x106   :  { %v546_v12 = vpop.f32.mrf.mxu0  ;;  %v623_v13 = vpop.f32.mrf.mxu1 }
 0x107   :  { %v634_v23 = vadd.f32 %v546_v12, %v342_v17  ;;  %v636_v24 = vadd.f32 %v623_v13, %v419_v18 }
 0x108   :  { %v548_v14 = vpop.f32.mrf.mxu0  ;;  %v625_v3 = vpop.f32.mrf.mxu1 }
 0x109   :  { %v635_v28 = vadd.f32 %v548_v14, %v344_v21  ;;  %v637_v29 = vadd.f32 %v625_v3, %v421_v22 }
 0x10c   :  { %v552_v15 = vpop.f32.mrf.mxu0  ;;  %v629_v16 = vpop.f32.mrf.mxu1 }
 0x10d   :  { %v638_v35 = vadd.f32 %v552_v15, %v348_v25  ;;  %v640_v45 = vadd.f32 %v629_v16, %v425_v32  ;;  %v908_v25 = vshrl.u32 %v907_v60, 7 }
 0x10e   :  { %v554_v19 = vpop.f32.mrf.mxu0  ;;  %v631_v20 = vpop.f32.mrf.mxu1 }
 0x10f   :  { %v639_v53 = vadd.f32 %v554_v19, %v350_v43  ;;  %v641_v57 = vadd.f32 %v631_v20, %v427_v44 }
 0x11e   :  { %v759_v26 = vpop.f32.mrf.mxu0  ;;  %v836_v27 = vpop.f32.mrf.mxu1 }
 0x11f   :  { %v847_v30 = vadd.f32 %v759_v26, %v634_v23  ;;  %v849_v31 = vadd.f32 %v836_v27, %v636_v24  ;;  %v914_v27 = vstv %s1797_s0 }
 0x120   :  { %v761_v36 = vpop.f32.mrf.mxu0  ;;  %v838_v37 = vpop.f32.mrf.mxu1  ;;  %vm915_vm13 = vcmp.lt.s32.totalorder %v908_v25, %v914_v27 }
 0x121   :  { %v855_v38 = vmul.f32 %v847_v30, %v847_v30  ;;  %v859_v39 = vmul.f32 %v849_v31, %v849_v31  ;;  %v848_v40 = vadd.f32 %v761_v36, %v635_v28  ;;  %v850_v41 = vadd.f32 %v838_v37, %v637_v29 }
 0x122   :  { %v765_v46 = vpop.f32.mrf.mxu0  ;;  %v842_v48 = vpop.f32.mrf.mxu1  ;;  %v909_v29 = vadd.s32 8, %v908_v25 }
 0x123   :  { %v863_v49 = vadd.f32 %v859_v39, %v855_v38  ;;  %v856_v50 = vmul.f32 %v848_v40, %v848_v40  ;;  %v860_v51 = vmul.f32 %v850_v41, %v850_v41  ;;  %v851_v52 = vadd.f32 %v765_v46, %v638_v35 }
 0x124   :  { %v853_v54 = vadd.f32 %v842_v48, %v640_v45  ;;  %v767_v55 = vpop.f32.mrf.mxu0  ;;  %v844_v56 = vpop.f32.mrf.mxu1  ;;  %vm916_vm14 = vcmp.lt.s32.totalorder %v909_v29, %v914_v27 }
 0x125   :  { %1155 = vrsqrt.f32 %v863_v49  ;;  %v864_v58 = vadd.f32 %v860_v51, %v856_v50  ;;  %v857_v59 = vmul.f32 %v851_v52, %v851_v52  ;;  %v852_v34 = vadd.f32 %v767_v55, %v639_v53 }
 0x126   :  { %v861_v6 = vmul.f32 %v853_v54, %v853_v54  ;;  %v854_v42 = vadd.f32 %v844_v56, %v641_v57  ;;  %vm869_vm5 = vcmp.eq.f32.partialorder %v863_v49, inf  ;;  %v872_v4 = vand.u32 2147483648, %v863_v49 }
 0x127   :  { %1157 = vrsqrt.f32 %v864_v58  ;;  %v858_v62 = vmul.f32 %v852_v34, %v852_v34  ;;  %vm871_vm6 = vcmp.eq.f32.partialorder %v863_v49, 0.0  ;;  %vm876_vm7 = vcmp.eq.f32.partialorder %v864_v58, inf }
 0x128   :  { %v865_v47 = vadd.f32 %v861_v6, %v857_v59  ;;  %v862_v63 = vmul.f32 %v854_v42, %v854_v42  ;;  %v879_v11 = vand.u32 2147483648, %v864_v58  ;;  %vm878_vm8 = vcmp.eq.f32.partialorder %v864_v58, 0.0 }
 0x129   :  { %v1172_v57 = vmov 1966171168  }
 0x12a   :  { %1159 = vrsqrt.f32 %v865_v47  ;;  %v866_v0 = vadd.f32 %v862_v63, %v858_v62  ;;  %vm883_vm9 = vcmp.eq.f32.partialorder %v865_v47, inf  ;;  %v886_v15 = vand.u32 2147483648, %v865_v47 }
 0x12b   :  { %vm885_vm10 = vcmp.eq.f32.partialorder %v865_v47, 0.0 }
 0x12c   :  { %1161 = vrsqrt.f32 %v866_v0  ;;  %vm890_vm11 = vcmp.eq.f32.partialorder %v866_v0, inf  ;;  %v893_v21 = vand.u32 2147483648, %v866_v0  ;;  %vm892_vm12 = vcmp.eq.f32.partialorder %v866_v0, 0.0 }
 0x132   :  { %v1156_v1 = vpop.eup %1155 }
 0x133   :  { %v868_v2 = vmul.f32 %v1156_v1, %v863_v49 }
 0x134   :  { %v1158_v5 = vpop.eup %1157 }
 0x135   :  { %v870_v7 = vsel %vm869_vm5, %v863_v49, %v868_v2  ;;  %v875_v9 = vmul.f32 %v1158_v5, %v864_v58 }
 0x136   :  { %v873_v8 = vsel %vm871_vm6, %v872_v4, %v870_v7 }
 0x137   :  { %v895_v10 = vadd.f32 1e-20, %v873_v8  ;;  %v1160_v33 = vpop.eup %1159  ;;  %v877_v12 = vsel %vm876_vm7, %v864_v58, %v875_v9  ;;  %v950_v58 = vunpack.c.l.s4 %v1172_v57 }
 0x138   :  { %v880_v13 = vsel %vm878_vm8, %v879_v11, %v877_v12  ;;  %v882_v14 = vmul.f32 %v1160_v33, %v865_v47 }
 0x139   :  { %1163 = vlog2.f32 %v895_v10  ;;  %v896_v3 = vadd.f32 1e-20, %v880_v13  ;;  %v1162_v16 = vpop.eup %1161 }
 0x13a   :  { %v884_v17 = vsel %vm883_vm9, %v865_v47, %v882_v14  ;;  %v889_v19 = vmul.f32 %v1162_v16, %v866_v0  ;;  %v931_v16 = vld [vmem:[%s1795_s3] sm:$0x3] }
 0x13b   :  { %1165 = vlog2.f32 %v896_v3  ;;  %v887_v18 = vsel %vm885_vm10, %v886_v15, %v884_v17 }
 0x13c   :  { %v897_v20 = vadd.f32 1e-20, %v887_v18  ;;  %v891_v22 = vsel %vm890_vm11, %v866_v0, %v889_v19  ;;  %v951_v0 = vunpack.c.0.s8 %v950_v58  ;;  %v970_v19 = vld [vmem:[%s1796_s4] sm:$0x3] }
 0x13d   :  { %v894_v23 = vsel %vm892_vm12, %v893_v21, %v891_v22 }
 0x13e   :  { %1167 = vlog2.f32 %v897_v20  ;;  %v898_v24 = vadd.f32 1e-20, %v894_v23  ;;  %v954_v9 = vsub.s32 %v951_v0, %v908_v25 }
 0x140   :  { %1169 = vlog2.f32 %v898_v24 }
 0x146   :  { %v1164_v26 = vpop.eup %1163 }
 0x147   :  { %v900_v28 = vmul.f32 0.6931472, %v1164_v26 }
 0x148   :  { %v1166_v30 = vpop.eup %1165 }
 0x149   :  { %v917_v32 = vsel %vm915_vm13, %v900_v28, 0.0  ;;  %v902_v35 = vmul.f32 0.6931472, %v1166_v30 }
 0x14a   :  { %v971_v38 = vmul.f32 %v917_v32, %v917_v32 }
 0x14b   :  { %v1168_v31 = vpop.eup %1167  ;;  %v918_v40 = vsel %vm915_vm13, %v902_v35, 0.0 }
 0x14c   :  { %v904_v36 = vmul.f32 0.6931472, %v1168_v31  ;;  %v972_v48 = vmul.f32 %v918_v40, %v918_v40 }
 0x14d   :  { %v1170_v37 = vpop.eup %1169 }
 0x14e   :  { %v919_v39 = vsel %vm916_vm14, %v904_v36, 0.0  ;;  %v906_v43 = vmul.f32 0.6931472, %v1170_v37 }
 0x14f   :  { %v932_v41 = vadd.f32 %v919_v39, %v917_v32  ;;  %v973_v60 = vmul.f32 %v919_v39, %v919_v39 }
 0x150   :  { %v920_v46 = vsel %vm916_vm14, %v906_v43, 0.0 }
 0x151   :  { %v933_v44 = vrot.slane %v932_v41, 4  ;;  %v975_v45 = vadd.f32 %v973_v60, %v971_v38  ;;  %v939_v49 = vadd.f32 %v920_v46, %v918_v40  ;;  %v974_v50 = vmul.f32 %v920_v46, %v920_v46 }
 0x153   :  { %v934_v51 = vadd.f32 %v933_v44, %v932_v41  ;;  %v976_v52 = vrot.slane %v975_v45, 4  ;;  %v940_v53 = vrot.slane %v939_v49, 4  ;;  %v982_v54 = vadd.f32 %v974_v50, %v972_v48 }
 0x155   :  { %v935_v55 = vrot.slane %v934_v51, 2  ;;  %v977_v56 = vadd.f32 %v976_v52, %v975_v45  ;;  %v941_v59 = vadd.f32 %v940_v53, %v939_v49  ;;  %v983_v6 = vrot.slane %v982_v54, 4 }
 0x157   :  { %v936_v34 = vadd.f32 %v935_v55, %v934_v51  ;;  %v978_v42 = vrot.slane %v977_v56, 2  ;;  %v942_v47 = vrot.slane %v941_v59, 2  ;;  %v984_v62 = vadd.f32 %v983_v6, %v982_v54 }
 0x159   :  { %v979_v63 = vadd.f32 %v978_v42, %v977_v56  ;;  %v937_v1 = vrot.slane %v936_v34, 1  ;;  %v943_v2 = vadd.f32 %v942_v47, %v941_v59  ;;  %v985_v4 = vrot.slane %v984_v62, 2 }
 0x15b   :  { %v980_v5 = vrot.slane %v979_v63, 1  ;;  %v944_v7 = vrot.slane %v943_v2, 1  ;;  %v986_v8 = vadd.f32 %v985_v4, %v984_v62  ;;  %v938_v10 = vadd.f32 %v937_v1, %v936_v34 }
 0x15d   :  { %v945_v11 = vadd.f32 %v944_v7, %v943_v2  ;;  %v987_v33 = vrot.slane %v986_v8, 1  ;;  %v981_v12 = vadd.f32 %v980_v5, %v979_v63 }
 0x15f   :  { %v948_v13 = vcombine.low %v938_v10, %v945_v11  ;;  %v988_v14 = vadd.f32 %v987_v33, %v986_v8 }
 0x161   :  { %v955_v3 = vrot.slane %v948_v13, %v954_v9  ;;  %v991_v15 = vcombine.low %v981_v12, %v988_v14 }
 0x163   :  { %v962_v17 = vrot.slane %v955_v3, %v954_v9  ;;  %v998_v18 = vrot.slane %v991_v15, %v954_v9 }
 0x165   :  { %v964_v20 = vadd.f32 %v962_v17, %v931_v16  ;;  %v1005_v21 = vrot.slane %v998_v18, %v954_v9 }
 0x167   :  { %969 = vst.msk [vmem:[%s1795_s3] sm:$0x3] %vm1757_vm4, %v964_v20  ;;  %v1007_v22 = vadd.f32 %v1005_v21, %v970_v19 }
 0x169   :  { %1008 = vst.msk [vmem:[%s1796_s4] sm:$0x3] %vm1757_vm4, %v1007_v22 }

// kernel: audio_preprocessing.3
= control target key start
LH: loop header
LB: loop body
LE: loop exit
PB: predicated region body
PF: predicated region fallthrough
CT: control target
= control target key end

     0   :  { %v1151_v3 = vmov 0.0   ;;  %vm687_vm0 = vcmask 1044480   ;;  %vm110_vm1 = vcmask 1046528   ;;  %vm116_vm2 = vcmask 654336   ;;  %s1152_s14 = smov 1.0   ;;  %s1779_s2 = inlined_call_operand.vmem [shape: f32[4,80,512], index: 2, kind: input, shape index: {}]   ;;  %s1780_s1 = inlined_call_operand.vmem [shape: f32[24,80], index: 1, kind: input, shape index: {}]   ;;  %s1781_s0 = inlined_call_operand.<no memory space> [shape: s32[1], index: 0, kind: input, shape index: {}]   ;;  %s1782_s3 = inlined_call_operand.vmem [shape: f32[1,256], index: 3, kind: input, shape index: {}]   ;;  %s1783_s4 = inlined_call_operand.vmem [shape: f32[1,256], index: 4, kind: input, shape index: {}]   ;;  %s1784_s5 = inlined_call_operand.vmem [shape: f32[16,256], index: 5, kind: output, shape index: {}]  }
   0x1   :  { %v1025_v0 = vld [vmem:[%s1779_s2 + $0x268] sm:$0xff]  ;;  %v1027_v1 = vld [vmem:[%s1779_s2 + $0x278] sm:$0xff]  ;;  %v1024_v2 = vld [vmem:[%s1779_s2 + $0x260] sm:$0xff]  ;;  %185 = vmatprep.mubr.f32.mxu0 %v1151_v3  ;;  %262 = vmatprep.mubr.f32.mxu1 %v1151_v3  ;;  %vm474_vm3 = vcmask 1045504   ;;  %s912_s12 = scvt.s32.f32 %s1781_s0 }
   0x2   :  { %133 = vmatprep.subr.mxu0 %v1025_v0  ;;  %210 = vmatprep.subr.mxu1 %v1027_v1  ;;  %v1026_v4 = vld [vmem:[%s1779_s2 + $0x270] sm:$0xff]  ;;  %v1021_v5 = vld [vmem:[%s1779_s2 + $0x248] sm:$0xff]  ;;  %v1023_v6 = vld [vmem:[%s1779_s2 + $0x258] sm:$0xff] }
   0x3   :  { %134 = vmatpush1.msra.mxu0 %v1024_v2  ;;  %211 = vmatpush1.msra.mxu1 %v1026_v4  ;;  %v1020_v7 = vld [vmem:[%s1779_s2 + $0x240] sm:$0xff]  ;;  %v1022_v8 = vld [vmem:[%s1779_s2 + $0x250] sm:$0xff]  ;;  %v1017_v9 = vld [vmem:[%s1779_s2 + $0x228] sm:$0xff]  ;;  %s1124_s13 = sadd.f32 -1.0, %s912_s12 }
   0x4   :  { %135 = vmatprep.subr.mxu0 %v1021_v5  ;;  %212 = vmatprep.subr.mxu1 %v1023_v6  ;;  %v1019_v10 = vld [vmem:[%s1779_s2 + $0x238] sm:$0xff]  ;;  %v1016_v11 = vld [vmem:[%s1779_s2 + $0x220] sm:$0xff]  ;;  %v1018_v12 = vld [vmem:[%s1779_s2 + $0x230] sm:$0xff] }
   0x5   :  { %136 = vmatpush1.msra.mxu0 %v1020_v7  ;;  %213 = vmatpush1.msra.mxu1 %v1022_v8  ;;  %v1013_v13 = vld [vmem:[%s1779_s2 + $0x208] sm:$0xff]  ;;  %v1015_v14 = vld [vmem:[%s1779_s2 + $0x218] sm:$0xff]  ;;  %v1012_v15 = vld [vmem:[%s1779_s2 + $0x200] sm:$0xff]  ;;  %s922_s15 = smax.f32 %s1152_s14, %s1124_s13 }
   0x6   :  { %137 = vmatprep.subr.mxu0 %v1017_v9  ;;  %214 = vmatprep.subr.mxu1 %v1019_v10  ;;  %v1014_v16 = vld [vmem:[%s1779_s2 + $0x210] sm:$0xff]  ;;  %v1009_v17 = vld [vmem:[%s1779_s2 + $0x1e8] sm:$0xff]  ;;  %v1011_v18 = vld [vmem:[%s1779_s2 + $0x1f8] sm:$0xff] }
   0x7   :  { %138 = vmatpush1.msra.mxu0 %v1016_v11  ;;  %215 = vmatpush1.msra.mxu1 %v1018_v12  ;;  %v1008_v19 = vld [vmem:[%s1779_s2 + $0x1e0] sm:$0xff]  ;;  %v1010_v20 = vld [vmem:[%s1779_s2 + $0x1f0] sm:$0xff]  ;;  %v1005_v21 = vld [vmem:[%s1779_s2 + $0x1c8] sm:$0xff] }
   0x8   :  { %139 = vmatprep.subr.mxu0 %v1013_v13  ;;  %216 = vmatprep.subr.mxu1 %v1015_v14  ;;  %v1007_v22 = vld [vmem:[%s1779_s2 + $0x1d8] sm:$0xff]  ;;  %v1004_v23 = vld [vmem:[%s1779_s2 + $0x1c0] sm:$0xff]  ;;  %v1006_v24 = vld [vmem:[%s1779_s2 + $0x1d0] sm:$0xff] }
   0x9   :  { %140 = vmatpush1.msra.mxu0 %v1012_v15  ;;  %217 = vmatpush1.msra.mxu1 %v1014_v16  ;;  %v1001_v25 = vld [vmem:[%s1779_s2 + $0x1a8] sm:$0xff]  ;;  %v1003_v26 = vld [vmem:[%s1779_s2 + $0x1b8] sm:$0xff]  ;;  %v1000_v27 = vld [vmem:[%s1779_s2 + $0x1a0] sm:$0xff] }
   0xa   :  { %141 = vmatprep.subr.mxu0 %v1009_v17  ;;  %218 = vmatprep.subr.mxu1 %v1011_v18  ;;  %v1002_v28 = vld [vmem:[%s1779_s2 + $0x1b0] sm:$0xff]  ;;  %v997_v29 = vld [vmem:[%s1779_s2 + $0x188] sm:$0xff]  ;;  %v999_v30 = vld [vmem:[%s1779_s2 + $0x198] sm:$0xff] }
   0xb   :  { %142 = vmatpush1.msra.mxu0 %v1008_v19  ;;  %219 = vmatpush1.msra.mxu1 %v1010_v20  ;;  %v996_v31 = vld [vmem:[%s1779_s2 + $0x180] sm:$0xff]  ;;  %v998_v32 = vld [vmem:[%s1779_s2 + $0x190] sm:$0xff]  ;;  %v1289_v34 = vld [vmem:[%s1780_s1 + $0x8] sm:$0xff] }
   0xc   :  { %143 = vmatprep.subr.mxu0 %v1005_v21  ;;  %220 = vmatprep.subr.mxu1 %v1007_v22  ;;  %v1284_v33 = vld [vmem:[%s1780_s1] sm:$0xff]  ;;  %v993_v35 = vld [vmem:[%s1779_s2 + $0x168] sm:$0xff]  ;;  %v995_v36 = vld [vmem:[%s1779_s2 + $0x178] sm:$0xff]  ;;  %v112_v38 = vrot.slane %v1289_v34, 1  ;;  %v689_v42 = vrot.slane %v1289_v34, 3 }
   0xd   :  { %144 = vmatpush1.msra.mxu0 %v1004_v23  ;;  %221 = vmatpush1.msra.mxu1 %v1006_v24  ;;  %v111_v37 = vrot.slane %v1284_v33, 1  ;;  %v992_v39 = vld [vmem:[%s1779_s2 + $0x160] sm:$0xff]  ;;  %v994_v40 = vld [vmem:[%s1779_s2 + $0x170] sm:$0xff]  ;;  %v688_v41 = vrot.slane %v1284_v33, 3  ;;  %v989_v43 = vld [vmem:[%s1779_s2 + $0x148] sm:$0xff] }
   0xe   :  { %145 = vmatprep.subr.mxu0 %v1001_v25  ;;  %222 = vmatprep.subr.mxu1 %v1003_v26  ;;  %v991_v44 = vld [vmem:[%s1779_s2 + $0x158] sm:$0xff]  ;;  %v988_v45 = vld [vmem:[%s1779_s2 + $0x140] sm:$0xff]  ;;  %v990_v46 = vld [vmem:[%s1779_s2 + $0x150] sm:$0xff] }
   0xf   :  { %146 = vmatpush1.msra.mxu0 %v1000_v27  ;;  %223 = vmatpush1.msra.mxu1 %v1002_v28  ;;  %v1322_v47 = vsel %vm687_vm0, %v688_v41, %v689_v42  ;;  %v113_v48 = vsel %vm110_vm1, %v111_v37, %v112_v38  ;;  %v63_v49 = vld [vmem:[%s1779_s2 + $0x128] sm:$0xff]  ;;  %v65_v50 = vld [vmem:[%s1779_s2 + $0x138] sm:$0xff]  ;;  %v62_v51 = vld [vmem:[%s1779_s2 + $0x120] sm:$0xff] }
  0x10   :  { %147 = vmatprep.subr.mxu0 %v997_v29  ;;  %224 = vmatprep.subr.mxu1 %v999_v30  ;;  %v64_v52 = vld [vmem:[%s1779_s2 + $0x130] sm:$0xff]  ;;  %v59_v53 = vld [vmem:[%s1779_s2 + $0x108] sm:$0xff]  ;;  %v61_v54 = vld [vmem:[%s1779_s2 + $0x118] sm:$0xff] }
  0x11   :  { %148 = vmatpush1.msra.mxu0 %v996_v31  ;;  %225 = vmatpush1.msra.mxu1 %v998_v32  ;;  %v58_v55 = vld [vmem:[%s1779_s2 + $0x100] sm:$0xff]  ;;  %v60_v56 = vld [vmem:[%s1779_s2 + $0x110] sm:$0xff]  ;;  %v55_v57 = vld [vmem:[%s1779_s2 + $0xe8] sm:$0xff] }
  0x12   :  { %149 = vmatprep.subr.mxu0 %v993_v35  ;;  %226 = vmatprep.subr.mxu1 %v995_v36  ;;  %v57_v58 = vld [vmem:[%s1779_s2 + $0xf8] sm:$0xff]  ;;  %v54_v59 = vld [vmem:[%s1779_s2 + $0xe0] sm:$0xff]  ;;  %v56_v60 = vld [vmem:[%s1779_s2 + $0xf0] sm:$0xff] }
  0x13   :  { %150 = vmatpush1.msra.mxu0 %v992_v39  ;;  %227 = vmatpush1.msra.mxu1 %v994_v40  ;;  %v51_v61 = vld [vmem:[%s1779_s2 + $0xc8] sm:$0xff]  ;;  %v53_v62 = vld [vmem:[%s1779_s2 + $0xd8] sm:$0xff]  ;;  %v50_v63 = vld [vmem:[%s1779_s2 + $0xc0] sm:$0xff] }
  0x14   :  { %151 = vmatprep.subr.mxu0 %v989_v43  ;;  %228 = vmatprep.subr.mxu1 %v991_v44  ;;  %v52_v0 = vld [vmem:[%s1779_s2 + $0xd0] sm:$0xff]  ;;  %v47_v1 = vld [vmem:[%s1779_s2 + $0xa8] sm:$0xff]  ;;  %v49_v2 = vld [vmem:[%s1779_s2 + $0xb8] sm:$0xff] }
  0x15   :  { %152 = vmatpush1.msra.mxu0 %v988_v45  ;;  %229 = vmatpush1.msra.mxu1 %v990_v46  ;;  %v46_v4 = vld [vmem:[%s1779_s2 + $0xa0] sm:$0xff]  ;;  %v48_v5 = vld [vmem:[%s1779_s2 + $0xb0] sm:$0xff]  ;;  %v43_v7 = vld [vmem:[%s1779_s2 + $0x88] sm:$0xff] }
  0x16   :  { %1028 = vmatmul.mubr.msk.f32.vlgmr.msra.gmra.mxu0 %vm116_vm2, %v113_v48  ;;  %1030 = vmatmul.mubr.msk.f32.vlgmr.msra.gmra.mxu1 %vm116_vm2, %v113_v48  ;;  %v1392_v6 = vld [vmem:[%s1780_s1 + $0x10] sm:$0xff]  ;;  %v45_v8 = vld [vmem:[%s1779_s2 + $0x98] sm:$0xff]  ;;  %v42_v9 = vld [vmem:[%s1779_s2 + $0x80] sm:$0xff] }
  0x17   :  { %291 = vmatprep.subr.mxu0 %v63_v49  ;;  %368 = vmatprep.subr.mxu1 %v65_v50  ;;  %v44_v10 = vld [vmem:[%s1779_s2 + $0x90] sm:$0xff]  ;;  %v39_v11 = vld [vmem:[%s1779_s2 + $0x68] sm:$0xff]  ;;  %v41_v12 = vld [vmem:[%s1779_s2 + $0x78] sm:$0xff]  ;;  %v114_v13 = vrot.slane %v1392_v6, 1 }
  0x18   :  { %292 = vmatpush1.msra.mxu0 %v62_v51  ;;  %369 = vmatpush1.msra.mxu1 %v64_v52  ;;  %v38_v14 = vld [vmem:[%s1779_s2 + $0x60] sm:$0xff]  ;;  %v40_v15 = vld [vmem:[%s1779_s2 + $0x70] sm:$0xff]  ;;  %v35_v16 = vld [vmem:[%s1779_s2 + $0x48] sm:$0xff] }
  0x19   :  { %293 = vmatprep.subr.mxu0 %v59_v53  ;;  %370 = vmatprep.subr.mxu1 %v61_v54  ;;  %v37_v17 = vld [vmem:[%s1779_s2 + $0x58] sm:$0xff]  ;;  %v115_v18 = vsel %vm110_vm1, %v112_v38, %v114_v13  ;;  %v34_v19 = vld [vmem:[%s1779_s2 + $0x40] sm:$0xff]  ;;  %v36_v20 = vld [vmem:[%s1779_s2 + $0x50] sm:$0xff] }
  0x1a   :  { %294 = vmatpush1.msra.mxu0 %v58_v55  ;;  %371 = vmatpush1.msra.mxu1 %v60_v56  ;;  %v31_v21 = vld [vmem:[%s1779_s2 + $0x28] sm:$0xff]  ;;  %v33_v22 = vld [vmem:[%s1779_s2 + $0x38] sm:$0xff]  ;;  %v30_v23 = vld [vmem:[%s1779_s2 + $0x20] sm:$0xff] }
  0x1b   :  { %295 = vmatprep.subr.mxu0 %v55_v57  ;;  %372 = vmatprep.subr.mxu1 %v57_v58  ;;  %v32_v24 = vld [vmem:[%s1779_s2 + $0x30] sm:$0xff]  ;;  %v27_v25 = vld [vmem:[%s1779_s2 + $0x8] sm:$0xff]  ;;  %v29_v26 = vld [vmem:[%s1779_s2 + $0x18] sm:$0xff] }
  0x1c   :  { %296 = vmatpush1.msra.mxu0 %v54_v59  ;;  %373 = vmatpush1.msra.mxu1 %v56_v60  ;;  %v26_v27 = vld [vmem:[%s1779_s2] sm:$0xff]  ;;  %v28_v28 = vld [vmem:[%s1779_s2 + $0x10] sm:$0xff]  ;;  %v1073_v29 = vld [vmem:[%s1779_s2 + $0x3a8] sm:$0xff] }
  0x1d   :  { %297 = vmatprep.subr.mxu0 %v51_v61  ;;  %374 = vmatprep.subr.mxu1 %v53_v62  ;;  %v1075_v30 = vld [vmem:[%s1779_s2 + $0x3b8] sm:$0xff]  ;;  %v1072_v31 = vld [vmem:[%s1779_s2 + $0x3a0] sm:$0xff]  ;;  %v1074_v32 = vld [vmem:[%s1779_s2 + $0x3b0] sm:$0xff] }
  0x1e   :  { %298 = vmatpush1.msra.mxu0 %v50_v63  ;;  %375 = vmatpush1.msra.mxu1 %v52_v0  ;;  %v1069_v35 = vld [vmem:[%s1779_s2 + $0x388] sm:$0xff]  ;;  %v1071_v36 = vld [vmem:[%s1779_s2 + $0x398] sm:$0xff]  ;;  %v1068_v37 = vld [vmem:[%s1779_s2 + $0x380] sm:$0xff] }
  0x1f   :  { %299 = vmatprep.subr.mxu0 %v47_v1  ;;  %376 = vmatprep.subr.mxu1 %v49_v2  ;;  %v1070_v38 = vld [vmem:[%s1779_s2 + $0x390] sm:$0xff]  ;;  %v1065_v39 = vld [vmem:[%s1779_s2 + $0x368] sm:$0xff]  ;;  %v1067_v40 = vld [vmem:[%s1779_s2 + $0x378] sm:$0xff] }
  0x20   :  { %300 = vmatpush1.msra.mxu0 %v46_v4  ;;  %377 = vmatpush1.msra.mxu1 %v48_v5  ;;  %v1064_v41 = vld [vmem:[%s1779_s2 + $0x360] sm:$0xff]  ;;  %v1066_v43 = vld [vmem:[%s1779_s2 + $0x370] sm:$0xff]  ;;  %v1061_v44 = vld [vmem:[%s1779_s2 + $0x348] sm:$0xff] }
  0x21   :  { %301 = vmatprep.subr.mxu0 %v43_v7  ;;  %378 = vmatprep.subr.mxu1 %v45_v8  ;;  %v1063_v45 = vld [vmem:[%s1779_s2 + $0x358] sm:$0xff]  ;;  %v1060_v46 = vld [vmem:[%s1779_s2 + $0x340] sm:$0xff]  ;;  %v1062_v48 = vld [vmem:[%s1779_s2 + $0x350] sm:$0xff]  ;;  %v475_v7 = vrot.slane %v1284_v33, 2  ;;  %v476_v8 = vrot.slane %v1289_v34, 2 }
  0x22   :  { %302 = vmatpush1.msra.mxu0 %v42_v9  ;;  %379 = vmatpush1.msra.mxu1 %v44_v10  ;;  %v1057_v49 = vld [vmem:[%s1779_s2 + $0x328] sm:$0xff]  ;;  %v1059_v50 = vld [vmem:[%s1779_s2 + $0x338] sm:$0xff]  ;;  %v1056_v51 = vld [vmem:[%s1779_s2 + $0x320] sm:$0xff] }
  0x23   :  { %303 = vmatprep.subr.mxu0 %v39_v11  ;;  %380 = vmatprep.subr.mxu1 %v41_v12  ;;  %v1058_v52 = vld [vmem:[%s1779_s2 + $0x330] sm:$0xff]  ;;  %v1053_v53 = vld [vmem:[%s1779_s2 + $0x308] sm:$0xff]  ;;  %v1055_v54 = vld [vmem:[%s1779_s2 + $0x318] sm:$0xff]  ;;  %v477_v12 = vsel %vm474_vm3, %v475_v7, %v476_v8 }
  0x24   :  { %304 = vmatpush1.msra.mxu0 %v38_v14  ;;  %381 = vmatpush1.msra.mxu1 %v40_v15  ;;  %v1052_v55 = vld [vmem:[%s1779_s2 + $0x300] sm:$0xff]  ;;  %v1054_v56 = vld [vmem:[%s1779_s2 + $0x310] sm:$0xff]  ;;  %v1049_v57 = vld [vmem:[%s1779_s2 + $0x2e8] sm:$0xff] }
  0x25   :  { %191 = vmatprep.mubr.f32.mxu0 %v1151_v3  ;;  %268 = vmatprep.mubr.f32.mxu1 %v1151_v3  ;;  %v1051_v58 = vld [vmem:[%s1779_s2 + $0x2f8] sm:$0xff]  ;;  %v1048_v59 = vld [vmem:[%s1779_s2 + $0x2e0] sm:$0xff]  ;;  %v1050_v60 = vld [vmem:[%s1779_s2 + $0x2f0] sm:$0xff] }
  0x26   :  { %305 = vmatprep.subr.mxu0 %v35_v16  ;;  %382 = vmatprep.subr.mxu1 %v37_v17  ;;  %v1045_v61 = vld [vmem:[%s1779_s2 + $0x2c8] sm:$0xff]  ;;  %v1047_v62 = vld [vmem:[%s1779_s2 + $0x2d8] sm:$0xff]  ;;  %v1044_v63 = vld [vmem:[%s1779_s2 + $0x2c0] sm:$0xff]  ;;  %v478_v17 = vrot.slane %v1392_v6, 2 }
  0x27   :  { %1029 = vmatmul.mubr.msk.f32.gmra.mxu0 %vm116_vm2, %v115_v18  ;;  %1031 = vmatmul.mubr.msk.f32.gmra.mxu1 %vm116_vm2, %v115_v18  ;;  %v1046_v0 = vld [vmem:[%s1779_s2 + $0x2d0] sm:$0xff]  ;;  %v1041_v1 = vld [vmem:[%s1779_s2 + $0x2a8] sm:$0xff]  ;;  %v1043_v2 = vld [vmem:[%s1779_s2 + $0x2b8] sm:$0xff] }
  0x28   :  { %306 = vmatpush1.msra.mxu0 %v34_v19  ;;  %383 = vmatpush1.msra.mxu1 %v36_v20  ;;  %v1040_v4 = vld [vmem:[%s1779_s2 + $0x2a0] sm:$0xff]  ;;  %v1042_v5 = vld [vmem:[%s1779_s2 + $0x2b0] sm:$0xff]  ;;  %v1037_v9 = vld [vmem:[%s1779_s2 + $0x288] sm:$0xff] }
  0x29   :  { %307 = vmatprep.subr.mxu0 %v31_v21  ;;  %384 = vmatprep.subr.mxu1 %v33_v22  ;;  %v1039_v10 = vld [vmem:[%s1779_s2 + $0x298] sm:$0xff]  ;;  %v1036_v11 = vld [vmem:[%s1779_s2 + $0x280] sm:$0xff]  ;;  %v1117_v13 = vld [vmem:[%s1779_s2 + $0x4e8] sm:$0xff]  ;;  %v479_v22 = vsel %vm474_vm3, %v476_v8, %v478_v17 }
  0x2a   :  { %308 = vmatpush1.msra.mxu0 %v30_v23  ;;  %385 = vmatpush1.msra.mxu1 %v32_v24  ;;  %v1119_v14 = vld [vmem:[%s1779_s2 + $0x4f8] sm:$0xff]  ;;  %v1116_v15 = vld [vmem:[%s1779_s2 + $0x4e0] sm:$0xff]  ;;  %v1118_v16 = vld [vmem:[%s1779_s2 + $0x4f0] sm:$0xff] }
  0x2b   :  { %309 = vmatprep.subr.mxu0 %v27_v25  ;;  %386 = vmatprep.subr.mxu1 %v29_v26  ;;  %v1113_v18 = vld [vmem:[%s1779_s2 + $0x4c8] sm:$0xff]  ;;  %v1115_v19 = vld [vmem:[%s1779_s2 + $0x4d8] sm:$0xff]  ;;  %v1112_v20 = vld [vmem:[%s1779_s2 + $0x4c0] sm:$0xff] }
  0x2c   :  { %310 = vmatpush1.msra.mxu0 %v26_v27  ;;  %343 = vmatprep.mubr.f32.mxu0 %v1151_v3  ;;  %v1114_v21 = vld [vmem:[%s1779_s2 + $0x4d0] sm:$0xff]  ;;  %v1109_v23 = vld [vmem:[%s1779_s2 + $0x4a8] sm:$0xff]  ;;  %v1111_v24 = vld [vmem:[%s1779_s2 + $0x4b8] sm:$0xff] }
  0x2d   :  { %387 = vmatpush1.msra.mxu1 %v28_v28  ;;  %420 = vmatprep.mubr.f32.mxu1 %v1151_v3  ;;  %v1108_v25 = vld [vmem:[%s1779_s2 + $0x4a0] sm:$0xff]  ;;  %v1110_v26 = vld [vmem:[%s1779_s2 + $0x4b0] sm:$0xff]  ;;  %v1105_v27 = vld [vmem:[%s1779_s2 + $0x488] sm:$0xff] }
  0x2e   :  { %1032 = vmatmul.mubr.msk.f32.vlgmr.msra.gmra.mxu0 %vm116_vm2, %v1284_v33  ;;  %1034 = vmatmul.mubr.msk.f32.vlgmr.msra.gmra.mxu1 %vm116_vm2, %v1284_v33  ;;  %v1038_v33 = vld [vmem:[%s1779_s2 + $0x290] sm:$0xff]  ;;  %v1107_v28 = vld [vmem:[%s1779_s2 + $0x498] sm:$0xff] }
  0x2f   :  { %496 = vmatprep.subr.mxu0 %v1073_v29  ;;  %573 = vmatprep.subr.mxu1 %v1075_v30  ;;  %v1104_v29 = vld [vmem:[%s1779_s2 + $0x480] sm:$0xff]  ;;  %v1106_v30 = vld [vmem:[%s1779_s2 + $0x490] sm:$0xff] }
  0x30   :  { %497 = vmatpush1.msra.mxu0 %v1072_v31  ;;  %574 = vmatpush1.msra.mxu1 %v1074_v32  ;;  %v1101_v31 = vld [vmem:[%s1779_s2 + $0x468] sm:$0xff]  ;;  %v1103_v32 = vld [vmem:[%s1779_s2 + $0x478] sm:$0xff] }
  0x31   :  { %498 = vmatprep.subr.mxu0 %v1069_v35  ;;  %575 = vmatprep.subr.mxu1 %v1071_v36  ;;  %v1100_v35 = vld [vmem:[%s1779_s2 + $0x460] sm:$0xff]  ;;  %v1102_v36 = vld [vmem:[%s1779_s2 + $0x470] sm:$0xff] }
  0x32   :  { %349 = vmatprep.mubr.f32.mxu0 %v1151_v3  ;;  %426 = vmatprep.mubr.f32.mxu1 %v1151_v3 }
  0x33   :  { %499 = vmatpush1.msra.mxu0 %v1068_v37  ;;  %576 = vmatpush1.msra.mxu1 %v1070_v38  ;;  %v1097_v37 = vld [vmem:[%s1779_s2 + $0x448] sm:$0xff]  ;;  %v1099_v38 = vld [vmem:[%s1779_s2 + $0x458] sm:$0xff] }
  0x34   :  { %1033 = vmatmul.mubr.msk.f32.gmra.mxu0 %vm116_vm2, %v1289_v34  ;;  %1035 = vmatmul.mubr.msk.f32.gmra.mxu1 %vm116_vm2, %v1289_v34 }
  0x35   :  { %500 = vmatprep.subr.mxu0 %v1065_v39  ;;  %577 = vmatprep.subr.mxu1 %v1067_v40  ;;  %v1096_v39 = vld [vmem:[%s1779_s2 + $0x440] sm:$0xff]  ;;  %v1098_v40 = vld [vmem:[%s1779_s2 + $0x450] sm:$0xff] }
  0x36   :  { %501 = vmatpush1.msra.mxu0 %v1064_v41  ;;  %578 = vmatpush1.msra.mxu1 %v1066_v43  ;;  %v1093_v41 = vld [vmem:[%s1779_s2 + $0x428] sm:$0xff]  ;;  %v1095_v43 = vld [vmem:[%s1779_s2 + $0x438] sm:$0xff] }
  0x37   :  { %502 = vmatprep.subr.mxu0 %v1061_v44  ;;  %579 = vmatprep.subr.mxu1 %v1063_v45  ;;  %v1092_v44 = vld [vmem:[%s1779_s2 + $0x420] sm:$0xff]  ;;  %v1094_v45 = vld [vmem:[%s1779_s2 + $0x430] sm:$0xff] }
  0x38   :  { %503 = vmatpush1.msra.mxu0 %v1060_v46  ;;  %580 = vmatpush1.msra.mxu1 %v1062_v48  ;;  %v1089_v46 = vld [vmem:[%s1779_s2 + $0x408] sm:$0xff]  ;;  %v1091_v48 = vld [vmem:[%s1779_s2 + $0x418] sm:$0xff] }
  0x39   :  { %504 = vmatprep.subr.mxu0 %v1057_v49  ;;  %581 = vmatprep.subr.mxu1 %v1059_v50  ;;  %v1088_v49 = vld [vmem:[%s1779_s2 + $0x400] sm:$0xff]  ;;  %v1090_v50 = vld [vmem:[%s1779_s2 + $0x410] sm:$0xff] }
  0x3a   :  { %505 = vmatpush1.msra.mxu0 %v1056_v51  ;;  %582 = vmatpush1.msra.mxu1 %v1058_v52  ;;  %v1085_v51 = vld [vmem:[%s1779_s2 + $0x3e8] sm:$0xff]  ;;  %v1087_v52 = vld [vmem:[%s1779_s2 + $0x3f8] sm:$0xff] }
  0x3b   :  { %506 = vmatprep.subr.mxu0 %v1053_v53  ;;  %583 = vmatprep.subr.mxu1 %v1055_v54  ;;  %v1084_v53 = vld [vmem:[%s1779_s2 + $0x3e0] sm:$0xff]  ;;  %v1086_v54 = vld [vmem:[%s1779_s2 + $0x3f0] sm:$0xff] }
  0x3c   :  { %507 = vmatpush1.msra.mxu0 %v1052_v55  ;;  %584 = vmatpush1.msra.mxu1 %v1054_v56  ;;  %v1081_v55 = vld [vmem:[%s1779_s2 + $0x3c8] sm:$0xff]  ;;  %v1083_v56 = vld [vmem:[%s1779_s2 + $0x3d8] sm:$0xff] }
  0x3d   :  { %508 = vmatprep.subr.mxu0 %v1049_v57  ;;  %585 = vmatprep.subr.mxu1 %v1051_v58  ;;  %v1080_v57 = vld [vmem:[%s1779_s2 + $0x3c0] sm:$0xff]  ;;  %v1082_v58 = vld [vmem:[%s1779_s2 + $0x3d0] sm:$0xff] }
  0x3e   :  { %509 = vmatpush1.msra.mxu0 %v1048_v59  ;;  %586 = vmatpush1.msra.mxu1 %v1050_v60  ;;  %v691_v59 = vrot.slane %v1392_v6, 3  ;;  %v914_v60 = vstv %s912_s12 }
  0x3f   :  { %510 = vmatprep.subr.mxu0 %v1045_v61  ;;  %587 = vmatprep.subr.mxu1 %v1047_v62  ;;  %1127 = vrcp.f32 %v914_v60 }
  0x40   :  { %511 = vmatpush1.msra.mxu0 %v1044_v63  ;;  %588 = vmatpush1.msra.mxu1 %v1046_v0  ;;  %v692_v6 = vsel %vm687_vm0, %v689_v42, %v691_v59 }
  0x41   :  { %512 = vmatprep.subr.mxu0 %v1041_v1  ;;  %589 = vmatprep.subr.mxu1 %v1043_v2  ;;  %v913_v2 = vld [vmem:[%s1782_s3] sm:$0x3] }
  0x42   :  { %513 = vmatpush1.msra.mxu0 %v1040_v4  ;;  %590 = vmatpush1.msra.mxu1 %v1042_v5  ;;  %v923_v4 = vstv %s922_s15 }
  0x43   :  { %514 = vmatprep.subr.mxu0 %v1037_v9  ;;  %591 = vmatprep.subr.mxu1 %v1039_v10  ;;  %1129 = vrcp.f32 %v923_v4 }
  0x44   :  { %515 = vmatpush1.msra.mxu0 %v1036_v11  ;;  %548 = vmatprep.mubr.f32.mxu0 %v1151_v3 }
  0x45   :  { %592 = vmatpush1.msra.mxu1 %v1038_v33  ;;  %625 = vmatprep.mubr.f32.mxu1 %v1151_v3 }
  0x46   :  { %1076 = vmatmul.mubr.msk.f32.vlgmr.msra.gmra.mxu0 %vm116_vm2, %v477_v12  ;;  %1078 = vmatmul.mubr.msk.f32.vlgmr.msra.gmra.mxu1 %vm116_vm2, %v477_v12 }
  0x47   :  { %709 = vmatprep.subr.mxu0 %v1117_v13  ;;  %786 = vmatprep.subr.mxu1 %v1119_v14  ;;  %v917_v14 = vld [vmem:[%s1783_s4] sm:$0x3] }
  0x48   :  { %710 = vmatpush1.msra.mxu0 %v1116_v15  ;;  %787 = vmatpush1.msra.mxu1 %v1118_v16 }
  0x49   :  { %711 = vmatprep.subr.mxu0 %v1113_v18  ;;  %788 = vmatprep.subr.mxu1 %v1115_v19 }
  0x4a   :  { %554 = vmatprep.mubr.f32.mxu0 %v1151_v3  ;;  %631 = vmatprep.mubr.f32.mxu1 %v1151_v3 }
  0x4b   :  { %712 = vmatpush1.msra.mxu0 %v1112_v20  ;;  %789 = vmatpush1.msra.mxu1 %v1114_v21 }
  0x4c   :  { %1077 = vmatmul.mubr.msk.f32.gmra.mxu0 %vm116_vm2, %v479_v22  ;;  %1079 = vmatmul.mubr.msk.f32.gmra.mxu1 %vm116_vm2, %v479_v22  ;;  %v1128_v34 = vpop.eup %1127 }
  0x4d   :  { %713 = vmatprep.subr.mxu0 %v1109_v23  ;;  %790 = vmatprep.subr.mxu1 %v1111_v24  ;;  %v1747_v5 = vmul.f32 %v1128_v34, %v913_v2 }
  0x4e   :  { %714 = vmatpush1.msra.mxu0 %v1108_v25  ;;  %791 = vmatpush1.msra.mxu1 %v1110_v26 }
  0x4f   :  { %715 = vmatprep.subr.mxu0 %v1105_v27  ;;  %792 = vmatprep.subr.mxu1 %v1107_v28  ;;  %v918_v9 = vmul.f32 %v1747_v5, %v914_v60 }
  0x50   :  { %716 = vmatpush1.msra.mxu0 %v1104_v29  ;;  %793 = vmatpush1.msra.mxu1 %v1106_v30  ;;  %v1130_v16 = vpop.eup %1129 }
  0x51   :  { %717 = vmatprep.subr.mxu0 %v1101_v31  ;;  %794 = vmatprep.subr.mxu1 %v1103_v32  ;;  %v919_v33 = vmul.f32 %v918_v9, %v1747_v5 }
  0x52   :  { %718 = vmatpush1.msra.mxu0 %v1100_v35  ;;  %795 = vmatpush1.msra.mxu1 %v1102_v36 }
  0x53   :  { %719 = vmatprep.subr.mxu0 %v1097_v37  ;;  %796 = vmatprep.subr.mxu1 %v1099_v38  ;;  %v920_v15 = vsub.f32 %v917_v14, %v919_v33 }
  0x54   :  { %720 = vmatpush1.msra.mxu0 %v1096_v39  ;;  %797 = vmatpush1.msra.mxu1 %v1098_v40 }
  0x55   :  { %721 = vmatprep.subr.mxu0 %v1093_v41  ;;  %798 = vmatprep.subr.mxu1 %v1095_v43  ;;  %v925_v21 = vmul.f32 %v1130_v16, %v920_v15 }
  0x56   :  { %722 = vmatpush1.msra.mxu0 %v1092_v44  ;;  %799 = vmatpush1.msra.mxu1 %v1094_v45 }
  0x57   :  { %723 = vmatprep.subr.mxu0 %v1089_v46  ;;  %800 = vmatprep.subr.mxu1 %v1091_v48  ;;  %v926_v24 = vmax.f32 %v925_v21, 0.0 }
  0x58   :  { %724 = vmatpush1.msra.mxu0 %v1088_v49  ;;  %801 = vmatpush1.msra.mxu1 %v1090_v50 }
  0x59   :  { %725 = vmatprep.subr.mxu0 %v1085_v51  ;;  %802 = vmatprep.subr.mxu1 %v1087_v52  ;;  %1131 = vrsqrt.f32 %v926_v24  ;;  %vm929_vm4 = vcmp.eq.f32.partialorder %v926_v24, inf  ;;  %v932_v33 = vand.u32 2147483648, %v926_v24  ;;  %vm931_vm5 = vcmp.eq.f32.partialorder %v926_v24, 0.0 }
  0x5a   :  { %726 = vmatpush1.msra.mxu0 %v1084_v53  ;;  %803 = vmatpush1.msra.mxu1 %v1086_v54 }
  0x5b   :  { %727 = vmatprep.subr.mxu0 %v1081_v55  ;;  %804 = vmatprep.subr.mxu1 %v1083_v56 }
  0x5c   :  { %728 = vmatpush1.msra.mxu0 %v1080_v57  ;;  %761 = vmatprep.mubr.f32.mxu0 %v1151_v3 }
  0x5d   :  { %805 = vmatpush1.msra.mxu1 %v1082_v58  ;;  %838 = vmatprep.mubr.f32.mxu1 %v1151_v3 }
  0x5e   :  { %1120 = vmatmul.mubr.msk.f32.vlgmr.msra.gmra.mxu0 %vm116_vm2, %v1322_v47  ;;  %1122 = vmatmul.mubr.msk.f32.vlgmr.msra.gmra.mxu1 %vm116_vm2, %v1322_v47 }
  0x5f   :  { %767 = vmatprep.mubr.f32.mxu0 %v1151_v3  ;;  %844 = vmatprep.mubr.f32.mxu1 %v1151_v3 }
  0x62   :  { %1121 = vmatmul.mubr.msk.f32.gmra.mxu0 %vm116_vm2, %v692_v6  ;;  %1123 = vmatmul.mubr.msk.f32.gmra.mxu1 %vm116_vm2, %v692_v6 }
  0x66   :  { %v1132_v34 = vpop.eup %1131 }
  0xd6   :  { %v187_v61 = vpop.f32.mrf.mxu0  ;;  %v264_v47 = vpop.f32.mrf.mxu1 }
  0xd8   :  { %v189_v62 = vpop.f32.mrf.mxu0  ;;  %v266_v63 = vpop.f32.mrf.mxu1 }
  0xe7   :  { %v193_v3 = vpop.f32.mrf.mxu0  ;;  %v270_v0 = vpop.f32.mrf.mxu1 }
  0xe9   :  { %v195_v42 = vpop.f32.mrf.mxu0  ;;  %v272_v1 = vpop.f32.mrf.mxu1 }
  0xee   :  { %v345_v7 = vpop.f32.mrf.mxu0  ;;  %v422_v8 = vpop.f32.mrf.mxu1 }
  0xef   :  { %v346_v27 = vadd.f32 %v345_v7, %v187_v61  ;;  %v423_v28 = vadd.f32 %v422_v8, %v264_v47 }
  0xf0   :  { %v347_v10 = vpop.f32.mrf.mxu0  ;;  %v424_v11 = vpop.f32.mrf.mxu1 }
  0xf1   :  { %v348_v31 = vadd.f32 %v347_v10, %v189_v62  ;;  %v425_v32 = vadd.f32 %v424_v11, %v266_v63 }
  0xf4   :  { %v351_v12 = vpop.f32.mrf.mxu0  ;;  %v428_v13 = vpop.f32.mrf.mxu1 }
  0xf5   :  { %v352_v37 = vadd.f32 %v351_v12, %v193_v3  ;;  %v429_v45 = vadd.f32 %v428_v13, %v270_v0 }
  0xf6   :  { %v353_v17 = vpop.f32.mrf.mxu0  ;;  %v430_v18 = vpop.f32.mrf.mxu1 }
  0xf7   :  { %v354_v54 = vadd.f32 %v353_v17, %v195_v42  ;;  %v431_v55 = vadd.f32 %v430_v18, %v272_v1  ;;  %v928_v1 = vmul.f32 %v1132_v34, %v926_v24 }
  0xf9   :  { %v930_v13 = vsel %vm929_vm4, %v926_v24, %v928_v1  ;;  %v937_v24 = vlaneseq }
  0xfa   :  { %v933_v14 = vsel %vm931_vm5, %v932_v33, %v930_v13 }
  0xfb   :  { %v934_v17 = vadd.f32 1e-05, %v933_v14 }
 0x106   :  { %v550_v19 = vpop.f32.mrf.mxu0  ;;  %v627_v20 = vpop.f32.mrf.mxu1 }
 0x107   :  { %v638_v35 = vadd.f32 %v550_v19, %v346_v27  ;;  %v640_v36 = vadd.f32 %v627_v20, %v423_v28 }
 0x108   :  { %v552_v22 = vpop.f32.mrf.mxu0  ;;  %v629_v23 = vpop.f32.mrf.mxu1 }
 0x109   :  { %v639_v40 = vadd.f32 %v552_v22, %v348_v31  ;;  %v641_v41 = vadd.f32 %v629_v23, %v425_v32 }
 0x10c   :  { %v556_v25 = vpop.f32.mrf.mxu0  ;;  %v633_v26 = vpop.f32.mrf.mxu1 }
 0x10d   :  { %v642_v46 = vadd.f32 %v556_v25, %v352_v37  ;;  %v644_v56 = vadd.f32 %v633_v26, %v429_v45 }
 0x10e   :  { %v558_v29 = vpop.f32.mrf.mxu0  ;;  %v635_v30 = vpop.f32.mrf.mxu1 }
 0x10f   :  { %v643_v47 = vadd.f32 %v558_v29, %v354_v54  ;;  %v645_v0 = vadd.f32 %v635_v30, %v431_v55 }
 0x11e   :  { %v763_v38 = vpop.f32.mrf.mxu0  ;;  %v840_v39 = vpop.f32.mrf.mxu1 }
 0x11f   :  { %v851_v43 = vadd.f32 %v763_v38, %v638_v35  ;;  %v853_v44 = vadd.f32 %v840_v39, %v640_v36  ;;  %v938_v38 = vshrl.u32 %v937_v24, 7 }
 0x120   :  { %v765_v48 = vpop.f32.mrf.mxu0  ;;  %v842_v49 = vpop.f32.mrf.mxu1 }
 0x121   :  { %v859_v50 = vmul.f32 %v851_v43, %v851_v43  ;;  %v863_v51 = vmul.f32 %v853_v44, %v853_v44  ;;  %v852_v52 = vadd.f32 %v765_v48, %v639_v40  ;;  %v854_v53 = vadd.f32 %v842_v49, %v641_v41 }
 0x122   :  { %v769_v57 = vpop.f32.mrf.mxu0  ;;  %v846_v58 = vpop.f32.mrf.mxu1  ;;  %v949_v45 = vsub.s32 0, %v938_v38  ;;  %v953_v48 = vsub.s32 1, %v938_v38 }
 0x123   :  { %v867_v59 = vadd.f32 %v863_v51, %v859_v50  ;;  %v860_v6 = vmul.f32 %v852_v52, %v852_v52  ;;  %v864_v60 = vmul.f32 %v854_v53, %v854_v53  ;;  %v855_v61 = vadd.f32 %v769_v57, %v642_v46 }
 0x124   :  { %v857_v62 = vadd.f32 %v846_v58, %v644_v56  ;;  %v771_v63 = vpop.f32.mrf.mxu0  ;;  %v848_v3 = vpop.f32.mrf.mxu1  ;;  %v950_v49 = vrot.slane %v1747_v5, %v949_v45  ;;  %v943_v52 = vstv %s1781_s0  ;;  %v954_v54 = vrot.slane %v1747_v5, %v953_v48 }
 0x125   :  { %1133 = vrsqrt.f32 %v867_v59  ;;  %v868_v2 = vadd.f32 %v864_v60, %v860_v6  ;;  %v861_v4 = vmul.f32 %v855_v61, %v855_v61  ;;  %v856_v8 = vadd.f32 %v771_v63, %v643_v47 }
 0x126   :  { %v865_v7 = vmul.f32 %v857_v62, %v857_v62  ;;  %v858_v42 = vadd.f32 %v848_v3, %v645_v0  ;;  %vm873_vm6 = vcmp.eq.f32.partialorder %v867_v59, inf  ;;  %v876_v18 = vand.u32 2147483648, %v867_v59 }
 0x127   :  { %1135 = vrsqrt.f32 %v868_v2  ;;  %v862_v10 = vmul.f32 %v856_v8, %v856_v8  ;;  %vm875_vm7 = vcmp.eq.f32.partialorder %v867_v59, 0.0  ;;  %vm880_vm8 = vcmp.eq.f32.partialorder %v868_v2, inf }
 0x128   :  { %v869_v9 = vadd.f32 %v865_v7, %v861_v4  ;;  %v866_v11 = vmul.f32 %v858_v42, %v858_v42  ;;  %v883_v25 = vand.u32 2147483648, %v868_v2  ;;  %vm882_vm9 = vcmp.eq.f32.partialorder %v868_v2, 0.0 }
 0x129   :  { %vm1759_vm14 = vcmp.lt.s32.totalorder %v938_v38, %v943_v52  ;;  %v939_v47 = vadd.s32 8, %v938_v38 }
 0x12a   :  { %1137 = vrsqrt.f32 %v869_v9  ;;  %v870_v12 = vadd.f32 %v866_v11, %v862_v10  ;;  %vm887_vm10 = vcmp.eq.f32.partialorder %v869_v9, inf  ;;  %v890_v31 = vand.u32 2147483648, %v869_v9 }
 0x12b   :  { %vm889_vm11 = vcmp.eq.f32.partialorder %v869_v9, 0.0  ;;  %vm945_vm15 = vcmp.lt.s32.totalorder %v939_v47, %v943_v52 }
 0x12c   :  { %1139 = vrsqrt.f32 %v870_v12  ;;  %vm894_vm12 = vcmp.eq.f32.partialorder %v870_v12, inf  ;;  %v897_v40 = vand.u32 2147483648, %v870_v12  ;;  %vm896_vm13 = vcmp.eq.f32.partialorder %v870_v12, 0.0 }
 0x12d   :  { %1141 = vrcp.f32 %v934_v17 }
 0x132   :  { %v1134_v15 = vpop.eup %1133 }
 0x133   :  { %v872_v16 = vmul.f32 %v1134_v15, %v867_v59 }
 0x134   :  { %v1136_v19 = vpop.eup %1135 }
 0x135   :  { %v874_v20 = vsel %vm873_vm6, %v867_v59, %v872_v16  ;;  %v879_v22 = vmul.f32 %v1136_v19, %v868_v2 }
 0x136   :  { %v877_v21 = vsel %vm875_vm7, %v876_v18, %v874_v20 }
 0x137   :  { %v899_v23 = vadd.f32 1e-20, %v877_v21  ;;  %v1138_v26 = vpop.eup %1137  ;;  %v881_v27 = vsel %vm880_vm8, %v868_v2, %v879_v22 }
 0x138   :  { %v884_v28 = vsel %vm882_vm9, %v883_v25, %v881_v27  ;;  %v886_v29 = vmul.f32 %v1138_v26, %v869_v9 }
 0x139   :  { %1143 = vlog2.f32 %v899_v23  ;;  %v900_v30 = vadd.f32 1e-20, %v884_v28  ;;  %v1140_v32 = vpop.eup %1139 }
 0x13a   :  { %v888_v35 = vsel %vm887_vm10, %v869_v9, %v886_v29  ;;  %v893_v37 = vmul.f32 %v1140_v32, %v870_v12  ;;  %v1142_v46 = vpop.eup %1141 }
 0x13b   :  { %1145 = vlog2.f32 %v900_v30  ;;  %v891_v36 = vsel %vm889_vm11, %v890_v31, %v888_v35  ;;  %v965_v53 = vrot.slane %v1142_v46, %v949_v45  ;;  %v969_v59 = vrot.slane %v1142_v46, %v953_v48 }
 0x13c   :  { %v901_v39 = vadd.f32 1e-20, %v891_v36  ;;  %v895_v41 = vsel %vm894_vm12, %v870_v12, %v893_v37 }
 0x13d   :  { %v898_v43 = vsel %vm896_vm13, %v897_v40, %v895_v41 }
 0x13e   :  { %1147 = vlog2.f32 %v901_v39  ;;  %v902_v44 = vadd.f32 1e-20, %v898_v43 }
 0x140   :  { %1149 = vlog2.f32 %v902_v44 }
 0x146   :  { %v1144_v50 = vpop.eup %1143 }
 0x147   :  { %v904_v51 = vmul.f32 0.6931472, %v1144_v50 }
 0x148   :  { %v1146_v55 = vpop.eup %1145 }
 0x149   :  { %v957_v56 = vsub.f32 %v904_v51, %v950_v49  ;;  %v906_v58 = vmul.f32 0.6931472, %v1146_v55 }
 0x14b   :  { %v972_v6 = vmul.f32 %v965_v53, %v957_v56  ;;  %v1148_v60 = vpop.eup %1147  ;;  %v958_v61 = vsub.f32 %v906_v58, %v954_v54 }
 0x14c   :  { %v908_v63 = vmul.f32 0.6931472, %v1148_v60 }
 0x14d   :  { %v976_v62 = vsel %vm1759_vm14, %v972_v6, 0.0  ;;  %v973_v5 = vmul.f32 %v969_v59, %v958_v61  ;;  %v1150_v3 = vpop.eup %1149 }
 0x14e   :  { %980 = vst [vmem:[%s1784_s5] sm:$0xff] %v976_v62  ;;  %v959_v0 = vsub.f32 %v908_v63, %v950_v49  ;;  %v910_v2 = vmul.f32 0.6931472, %v1150_v3 }
 0x14f   :  { %v977_v34 = vsel %vm1759_vm14, %v973_v5, 0.0 }
 0x150   :  { %981 = vst [vmem:[%s1784_s5 + $0x8] sm:$0xff] %v977_v34  ;;  %v974_v4 = vmul.f32 %v965_v53, %v959_v0  ;;  %v960_v7 = vsub.f32 %v910_v2, %v954_v54 }
 0x152   :  { %v978_v8 = vsel %vm945_vm15, %v974_v4, 0.0  ;;  %v975_v42 = vmul.f32 %v969_v59, %v960_v7 }
 0x153   :  { %982 = vst [vmem:[%s1784_s5 + $0x10] sm:$0xff] %v978_v8 }
 0x154   :  { %v979_v1 = vsel %vm945_vm15, %v975_v42, 0.0 }
 0x155   :  { %983 = vst [vmem:[%s1784_s5 + $0x18] sm:$0xff] %v979_v1 }

</bundles_post_ra>
